<compile_context>
chip_gen: v6e
topology: v6e:2x2x1
jax: 0.10.0
libtpu: 0.0.40
codegen_flags: <defaults>
</compile_context>

<pallas_src>
import numpy as np
import jax
import jax.numpy as jnp
from jax.experimental import pallas as pl
from jax.experimental.pallas import tpu as pltpu

MAX_TILE = 4096     # px tile cap (lanes); large tiles amortize per-grid-step overhead


def pick_px_tile(px, cap=MAX_TILE):
    """Largest multiple of 128 that divides px, capped at `cap`."""
    assert px % 128 == 0, "px (= rows*cols) must be a multiple of 128"
    t = min(px, cap)
    t -= t % 128
    while px % t:
        t -= 128
    return t


# ----------------------------------------------------------------------------
# Fused kernel: MixModel forward (background=True path) + contrast statistics
#               + all MINE statistics networks, one pixel tile per grid step.
#
#   ns[s, :]   = clip( sum_c clip(x[c,:] - bg[c,s], 0, 1) * (alpha*mm)[c,s] , 0, 1)
#   st[s, :]   = [sum(xs), sum(xs^2), sum(ns), sum(ns^2)]   (0.5-centered)
#   mi[p, :]   = [sum T_joint, max T_marg, sum exp(T_marg - max)]   per MINE pair
# ----------------------------------------------------------------------------
def make_fused_kernel(n_sinks, sink_rows, pairs, tpx):
    sink_rows = tuple(int(r) for r in sink_rows)
    pairs = tuple((int(snk), int(src)) for snk, src in pairs)

    def kernel(x_ref, xm_ref, bg_ref, w_ref,
               w1_ref, b1_ref, w2_ref, b2_ref, w3_ref, b3_ref,
               st_ref, mi_ref):
        x = x_ref[...]                                            # (C, TPX) joint tile
        xm = xm_ref[...]                                          # (C, TPX) marginal tile
        bg = bg_ref[...]                                          # (C, S)
        w = w_ref[...]                                            # (C, S)

        # ---- MixModel forward (background=True path), static unroll over sinks ----
        rows = []
        for s in range(n_sinks):
            t = jnp.clip(x - bg[:, s:s + 1], 0.0, 1.0)            # Hardtanh(x - bg_s)
            y = jnp.sum(t * w[:, s:s + 1], axis=0, keepdims=True)  # matvec over channels
            rows.append(jnp.clip(y, 0.0, 1.0))                    # final Hardtanh
        ns = jnp.concatenate(rows, axis=0)                        # (S, TPX)

        # ---- contrast statistics (centering at 0.5 reduces f32 cancellation) ----
        xs = jnp.concatenate([x[r:r + 1, :] for r in sink_rows], axis=0)  # (S, TPX)
        xs_c = xs - 0.5
        ns_c = ns - 0.5
        st_ref[...] = jnp.concatenate(
            [jnp.sum(xs_c, axis=1, keepdims=True),
             jnp.sum(xs_c * xs_c, axis=1, keepdims=True),
             jnp.sum(ns_c, axis=1, keepdims=True),
             jnp.sum(ns_c * ns_c, axis=1, keepdims=True)], axis=1)        # (S, 4)

        # ---- marginal source samples: global pixel permutation built from a
        #      tile shift (via the xm index_map) plus a half-tile lane swap ----
        half = tpx // 2
        xm_perm = jnp.concatenate([xm[:, half:], xm[:, :half]], axis=1)   # (C, TPX)

        # ---- MINE statistics networks T(x, y), static unroll over pairs ----
        out_rows = []
        for p, (snk, src) in enumerate(pairs):
            x0 = ns[snk:snk + 1, :]                               # sink channel (no_spill)
            x0 = jnp.concatenate([x0, x0], axis=1)                # (1, 2*TPX) joint|marg
            x1 = jnp.concatenate([x[src:src + 1, :],
                                  xm_perm[src:src + 1, :]], axis=1)
            w1 = w1_ref[p]                                        # (HP, 2)
            h1 = jnp.maximum(w1[:, 0:1] * x0 + w1[:, 1:2] * x1 + b1_ref[p], 0.0)
            h2 = jnp.dot(w2_ref[p], h1,
                         preferred_element_type=jnp.float32) + b2_ref[p]  # (HP, 2T) MXU
            h2 = jnp.maximum(h2, 0.0)
            # 1-wide output layer on the VPU + sublane reduce instead of an N=1 matmul
            t_all = jnp.sum(h2 * w3_ref[p], axis=0, keepdims=True) + b3_ref[p]  # (1, 2T)

            tj = t_all[:, :tpx]
            tm = t_all[:, tpx:]
            tj_sum = jnp.sum(tj, axis=1, keepdims=True)           # (1, 1)
            m = jnp.max(tm, axis=1, keepdims=True)
            se = jnp.sum(jnp.exp(tm - m), axis=1, keepdims=True)
            out_rows.append(jnp.concatenate([tj_sum, m, se], axis=1))     # (1, 3)
        mi_ref[...] = jnp.concatenate(out_rows, axis=0)           # (n_pairs, 3)

    return kernel


def picasso_fused_forward(x_t, bg, w, mine_params, sink_rows, pairs, tpx):
    c, px = x_t.shape
    s = bg.shape[1]
    n_tiles = px // tpx
    n_pairs = len(pairs)
    w1, b1, w2, b2, w3, b3 = mine_params
    hp = w1.shape[1]
    shift = n_tiles // 2

    def marg_map(i):
        j = i + shift
        return (0, jnp.where(j >= n_tiles, j - n_tiles, j))

    return pl.pallas_call(
        make_fused_kernel(s, sink_rows, pairs, tpx),
        out_shape=(jax.ShapeDtypeStruct((n_tiles, s, 4), jnp.float32),
                   jax.ShapeDtypeStruct((n_tiles, n_pairs, 3), jnp.float32)),
        grid_spec=pltpu.PrefetchScalarGridSpec(
            num_scalar_prefetch=0,
            grid=(n_tiles,),
            in_specs=[pl.BlockSpec((c, tpx), lambda i: (0, i)),     # joint tile
                      pl.BlockSpec((c, tpx), marg_map),             # marginal tile
                      pl.BlockSpec((c, s), lambda i: (0, 0)),
                      pl.BlockSpec((c, s), lambda i: (0, 0)),
                      pl.BlockSpec((n_pairs, hp, 2), lambda i: (0, 0, 0)),
                      pl.BlockSpec((n_pairs, hp, 1), lambda i: (0, 0, 0)),
                      pl.BlockSpec((n_pairs, hp, hp), lambda i: (0, 0, 0)),
                      pl.BlockSpec((n_pairs, hp, 1), lambda i: (0, 0, 0)),
                      pl.BlockSpec((n_pairs, hp, 1), lambda i: (0, 0, 0)),
                      pl.BlockSpec((n_pairs, 1, 1), lambda i: (0, 0, 0))],
            out_specs=[pl.BlockSpec((None, s, 4), lambda i: (i, 0, 0)),
                       pl.BlockSpec((None, n_pairs, 3), lambda i: (i, 0, 0))]),
        compiler_params=pltpu.CompilerParams(dimension_semantics=("parallel",)),
    )(x_t, x_t, bg, w, w1, b1, w2, b2, w3, b3)


def init_mine_params_stacked(neurons, n_pairs, seed_base=100):
    """PyTorch nn.Linear default init U(-1/sqrt(fan_in), 1/sqrt(fan_in)); weights stored
       in transposed-compute orientation, zero-padded to the next multiple of 8 sublanes,
       stacked along a leading pair axis.  Padded units are exactly inert."""
    hp = max(8, ((neurons + 7) // 8) * 8)
    w1 = np.zeros((n_pairs, hp, 2), np.float32)
    b1 = np.zeros((n_pairs, hp, 1), np.float32)
    w2 = np.zeros((n_pairs, hp, hp), np.float32)
    b2 = np.zeros((n_pairs, hp, 1), np.float32)
    w3 = np.zeros((n_pairs, hp, 1), np.float32)
    b3 = np.zeros((n_pairs, 1, 1), np.float32)
    for p in range(n_pairs):
        ks = jax.random.split(jax.random.PRNGKey(seed_base + p), 6)

        def u(k, shape, fan_in):
            bound = 1.0 / np.sqrt(fan_in)
            return np.asarray(jax.random.uniform(k, shape, jnp.float32, -bound, bound))

        w1[p, :neurons, :] = u(ks[0], (neurons, 2), 2)                      # Linear(2,H).weight
        b1[p, :neurons, 0] = u(ks[1], (neurons,), 2)
        w2[p, :neurons, :neurons] = u(ks[2], (neurons, neurons), neurons)   # Linear(H,H).weight
        b2[p, :neurons, 0] = u(ks[3], (neurons,), neurons)
        w3[p, :neurons, 0] = u(ks[4], (neurons,), neurons)                  # Linear(H,1).weight
        b3[p, 0, 0] = u(ks[5], (1,), neurons)[0]
    return tuple(jnp.asarray(a) for a in (w1, b1, w2, b2, w3, b3))


# ----------------------------------------------------------------------------
# PICASSOnn (forward pass only), parameters built deterministically in-script.
# ----------------------------------------------------------------------------
class PICASSOnnPallas:
    def __init__(self, mixing_matrix, px_bit_depth=12, mi_weight=0.9, background=True,
                 min_alpha=0.01, max_alpha=2.0, max_background=0.2):
        mm = np.asarray(mixing_matrix, dtype=np.float32)
        if mm.ndim == 1:
            mm = mm[:, None]
        mm = mm.copy()
        mm[mm < 0] = -1
        assert ((mm == 1).sum(axis=0) == 1).all()
        assert ((mm == 1).sum(axis=1) <= 1).all()
        assert ((mm == -1).sum(axis=0) >= 1).all()
        self.n_images, self.n_sinks = mm.shape
        self.mm = mm
        self.sink_mask = (mm == 1).sum(axis=1) == 1
        self.sink_rows = np.where(self.sink_mask)[0]      # sink channel rows (positional, as in torch)
        # pairs of (sink column index, source row index) where mm == -1
        self.pairs = [(ii, i) for i in range(self.n_images) for ii in range(self.n_sinks)
                      if mm[i, ii] == -1]
        self.n_pairs = len(self.pairs)
        assert 0 < mi_weight < 1
        self.mi_weight = float(mi_weight)
        self.contrast_weight = 1.0 - float(mi_weight)
        assert background, "only the default background=True MixModel path is implemented"

        # MixModel parameters after __init__ + constrain():
        alpha = np.clip(np.ones_like(mm), min_alpha, max_alpha)
        alpha[mm == 1] = 1.0
        alpha[mm == 0] = 0.0
        bg = np.clip(np.ones_like(mm) / 100.0, 0.0, max_background)
        bg[(mm == 1) | (mm == 0)] = 0.0
        self.w = jnp.asarray(alpha * mm, dtype=jnp.float32)       # (C, S)
        self.bg = jnp.asarray(bg, dtype=jnp.float32)              # (C, S)

        # TODO(synk): MINE class is not defined in the provided source; implementing the
        # standard Donsker-Varadhan MINE MLP (2 -> neurons -> neurons -> 1, ReLU).
        self.mine_params = init_mine_params_stacked(px_bit_depth, self.n_pairs)

        self._forward = jax.jit(self._forward_impl)

    def contrast_loss_from_stats(self, stats, n, k2=0.03):
        c2 = (1.0 * k2) ** 2
        sum_x, sumsq_x = stats[:, 0], stats[:, 1]
        sum_y, sumsq_y = stats[:, 2], stats[:, 3]
        # unbiased variance (torch.var default) from (0.5-centered) sums / sums of squares
        var_x = jnp.maximum((sumsq_x - sum_x * sum_x / n) / (n - 1), 0.0)
        var_y = jnp.maximum((sumsq_y - sum_y * sum_y / n) / (n - 1), 0.0)
        score = (2.0 * jnp.sqrt(var_x) * jnp.sqrt(var_y) + c2) / (var_x + var_y + c2)
        return 1.0 - score

    def _forward_impl(self, images):
        px = images.shape[0]
        tpx = pick_px_tile(px)
        x_t = jnp.transpose(images)                               # (C, px), lane-dense layout

        # --- one fused Pallas kernel: MixModel + contrast stats + all MINE pairs ---
        stats_p, mine_p = picasso_fused_forward(
            x_t, self.bg, self.w, self.mine_params, self.sink_rows, self.pairs, tpx)

        # contrast loss from accumulated per-tile statistics
        stats = jnp.sum(stats_p, axis=0)                          # (S, 4)
        c_loss = self.contrast_loss_from_stats(stats, px) * self.contrast_weight

        # MINE Donsker-Varadhan bound from per-tile partials (stable LSE merge)
        # TODO(synk): torch.randperm marginal shuffle replaced by a deterministic
        # pixel permutation (tile shift + half-tile lane swap) inside the kernel.
        tj_sum = jnp.sum(mine_p[:, :, 0], axis=0)                 # (n_pairs,)
        m_tile = mine_p[:, :, 1]                                  # (n_tiles, n_pairs)
        s_tile = mine_p[:, :, 2]
        m_glob = jnp.max(m_tile, axis=0)
        s_glob = jnp.sum(s_tile * jnp.exp(m_tile - m_glob[None, :]), axis=0)
        mi_est = tj_sum / px - (m_glob + jnp.log(s_glob / px))    # E[T_j] - log E[exp(T_m)]
        mi = (1.0 - mi_est) * self.mi_weight
        scale = jnp.where(mi < 0.0, 0.0, jnp.where(mi < 1.0, mi, 1.0))
        mi_loss = mi * scale

        total_loss = jnp.sum(mi_loss) + jnp.sum(c_loss)
        return total_loss, mi_loss, c_loss

    def forward(self, images):
        """images: (px, C) float32, px = rows*cols, C = number of input images."""
        assert images.ndim == 2 and images.shape[1] == self.n_images
        assert images.shape[0] % 128 == 0
        return self._forward(images)


if __name__ == "__main__":
    # Mixing matrix: 4 input images, 2 sinks.
    #   col 0: sink = image 0, sources = images 1, 3
    #   col 1: sink = image 1, sources = images 2, 3
    mixing_matrix = np.array([[1, 0],
                              [-1, 1],
                              [0, -1],
                              [-1, -1]], dtype=np.float32)

    n_images = 4
    rows, cols = 16, 16
    px = rows * cols                                      # 256 pixels

    key = jax.random.PRNGKey(0)
    # flattened, max-normalized images stacked by column: (px, n_images), values in [0, 1]
    images = jax.random.uniform(key, (px, n_images), dtype=jnp.float32)

    model = PICASSOnnPallas(mixing_matrix, px_bit_depth=12, mi_weight=0.9)
    total_loss, mi_loss, c_loss = model.forward(images)
    jax.block_until_ready((total_loss, mi_loss, c_loss))

    assert total_loss.shape == ()
    assert mi_loss.shape == (model.n_pairs,)
    assert c_loss.shape == (model.n_sinks,)
    assert bool(jnp.isfinite(total_loss))
    print("KERNEL_OK")
</pallas_src>

<mosaic_0001>
module attributes {stable_mosaic.version = 11 : i64} {
  func.func @kernel(%arg0: i32, %arg1: memref<4x256xf32, #tpu.memory_space<vmem>>, %arg2: memref<4x256xf32, #tpu.memory_space<vmem>>, %arg3: memref<4x2xf32, #tpu.memory_space<vmem>>, %arg4: memref<4x2xf32, #tpu.memory_space<vmem>>, %arg5: memref<4x16x2xf32, #tpu.memory_space<vmem>>, %arg6: memref<4x16x1xf32, #tpu.memory_space<vmem>>, %arg7: memref<4x16x16xf32, #tpu.memory_space<vmem>>, %arg8: memref<4x16x1xf32, #tpu.memory_space<vmem>>, %arg9: memref<4x16x1xf32, #tpu.memory_space<vmem>>, %arg10: memref<4x1x1xf32, #tpu.memory_space<vmem>>, %arg11: memref<1x2x4xf32, #tpu.memory_space<vmem>>, %arg12: memref<1x4x3xf32, #tpu.memory_space<vmem>>) attributes {dimension_semantics = [#tpu.dimension_semantics<parallel>], iteration_bounds = array<i64: 1>, scalar_prefetch = 0 : i64, scratch_operands = 0 : i64, tpu.core_type = #tpu.core_type<tc>, window_params = [{transform_indices = @transform_0, window_bounds = array<i64: 4, 256>}, {transform_indices = @transform_1, window_bounds = array<i64: 4, 256>}, {pipeline_mode = #tpu.pipeline_mode<synchronous>, transform_indices = @transform_2, window_bounds = array<i64: 4, 2>}, {pipeline_mode = #tpu.pipeline_mode<synchronous>, transform_indices = @transform_3, window_bounds = array<i64: 4, 2>}, {pipeline_mode = #tpu.pipeline_mode<synchronous>, transform_indices = @transform_4, window_bounds = array<i64: 4, 16, 2>}, {pipeline_mode = #tpu.pipeline_mode<synchronous>, transform_indices = @transform_5, window_bounds = array<i64: 4, 16, 1>}, {pipeline_mode = #tpu.pipeline_mode<synchronous>, transform_indices = @transform_6, window_bounds = array<i64: 4, 16, 16>}, {pipeline_mode = #tpu.pipeline_mode<synchronous>, transform_indices = @transform_7, window_bounds = array<i64: 4, 16, 1>}, {pipeline_mode = #tpu.pipeline_mode<synchronous>, transform_indices = @transform_8, window_bounds = array<i64: 4, 16, 1>}, {pipeline_mode = #tpu.pipeline_mode<synchronous>, transform_indices = @transform_9, window_bounds = array<i64: 4, 1, 1>}, {transform_indices = @transform_10, window_bounds = array<i64: 1, 2, 4>}, {transform_indices = @transform_11, window_bounds = array<i64: 1, 4, 3>}]} {
    %c0 = arith.constant 0 : index
    %c0_0 = arith.constant 0 : index
    %0 = vector.load %arg1[%c0, %c0_0] : memref<4x256xf32, #tpu.memory_space<vmem>>, vector<4x256xf32>
    %c0_1 = arith.constant 0 : index
    %c0_2 = arith.constant 0 : index
    %1 = vector.load %arg2[%c0_1, %c0_2] : memref<4x256xf32, #tpu.memory_space<vmem>>, vector<4x256xf32>
    %c0_3 = arith.constant 0 : index
    %c0_4 = arith.constant 0 : index
    %2 = vector.load %arg3[%c0_3, %c0_4] : memref<4x2xf32, #tpu.memory_space<vmem>>, vector<4x2xf32>
    %c0_5 = arith.constant 0 : index
    %c0_6 = arith.constant 0 : index
    %3 = vector.load %arg4[%c0_5, %c0_6] : memref<4x2xf32, #tpu.memory_space<vmem>>, vector<4x2xf32>
    %4 = vector.extract_strided_slice %2 {offsets = [0, 0], sizes = [4, 1], strides = [1, 1]} : vector<4x2xf32> to vector<4x1xf32>
    %5 = vector.broadcast %4 : vector<4x1xf32> to vector<4x256xf32>
    %6 = arith.subf %0, %5 : vector<4x256xf32>
    %cst = arith.constant 0.000000e+00 : f32
    %cst_7 = arith.constant 1.000000e+00 : f32
    %7 = vector.broadcast %cst : f32 to vector<4x256xf32>
    %8 = arith.maximumf %7, %6 : vector<4x256xf32>
    %9 = vector.broadcast %cst_7 : f32 to vector<4x256xf32>
    %10 = arith.minimumf %9, %8 : vector<4x256xf32>
    %11 = vector.extract_strided_slice %3 {offsets = [0, 0], sizes = [4, 1], strides = [1, 1]} : vector<4x2xf32> to vector<4x1xf32>
    %12 = vector.broadcast %11 : vector<4x1xf32> to vector<4x256xf32>
    %13 = arith.mulf %10, %12 : vector<4x256xf32>
    %cst_8 = arith.constant dense<0.000000e+00> : vector<256xf32>
    %14 = vector.multi_reduction <add>, %13, %cst_8 [0] : vector<4x256xf32> to vector<256xf32>
    %15 = vector.shape_cast %14 : vector<256xf32> to vector<1x256xf32>
    %cst_9 = arith.constant 0.000000e+00 : f32
    %cst_10 = arith.constant 1.000000e+00 : f32
    %16 = vector.broadcast %cst_9 : f32 to vector<1x256xf32>
    %17 = arith.maximumf %16, %15 : vector<1x256xf32>
    %18 = vector.broadcast %cst_10 : f32 to vector<1x256xf32>
    %19 = arith.minimumf %18, %17 : vector<1x256xf32>
    %20 = vector.extract_strided_slice %2 {offsets = [0, 1], sizes = [4, 1], strides = [1, 1]} : vector<4x2xf32> to vector<4x1xf32>
    %21 = vector.broadcast %20 : vector<4x1xf32> to vector<4x256xf32>
    %22 = arith.subf %0, %21 : vector<4x256xf32>
    %cst_11 = arith.constant 0.000000e+00 : f32
    %cst_12 = arith.constant 1.000000e+00 : f32
    %23 = vector.broadcast %cst_11 : f32 to vector<4x256xf32>
    %24 = arith.maximumf %23, %22 : vector<4x256xf32>
    %25 = vector.broadcast %cst_12 : f32 to vector<4x256xf32>
    %26 = arith.minimumf %25, %24 : vector<4x256xf32>
    %27 = vector.extract_strided_slice %3 {offsets = [0, 1], sizes = [4, 1], strides = [1, 1]} : vector<4x2xf32> to vector<4x1xf32>
    %28 = vector.broadcast %27 : vector<4x1xf32> to vector<4x256xf32>
    %29 = arith.mulf %26, %28 : vector<4x256xf32>
    %cst_13 = arith.constant dense<0.000000e+00> : vector<256xf32>
    %30 = vector.multi_reduction <add>, %29, %cst_13 [0] : vector<4x256xf32> to vector<256xf32>
    %31 = vector.shape_cast %30 : vector<256xf32> to vector<1x256xf32>
    %cst_14 = arith.constant 0.000000e+00 : f32
    %cst_15 = arith.constant 1.000000e+00 : f32
    %32 = vector.broadcast %cst_14 : f32 to vector<1x256xf32>
    %33 = arith.maximumf %32, %31 : vector<1x256xf32>
    %34 = vector.broadcast %cst_15 : f32 to vector<1x256xf32>
    %35 = arith.minimumf %34, %33 : vector<1x256xf32>
    %36 = tpu.concatenate %19, %35 in 0 : vector<1x256xf32>, vector<1x256xf32> -> vector<2x256xf32>
    %37 = vector.extract_strided_slice %0 {offsets = [0, 0], sizes = [1, 256], strides = [1, 1]} : vector<4x256xf32> to vector<1x256xf32>
    %38 = vector.extract_strided_slice %0 {offsets = [1, 0], sizes = [1, 256], strides = [1, 1]} : vector<4x256xf32> to vector<1x256xf32>
    %39 = tpu.concatenate %37, %38 in 0 : vector<1x256xf32>, vector<1x256xf32> -> vector<2x256xf32>
    %cst_16 = arith.constant 5.000000e-01 : f32
    %40 = vector.broadcast %cst_16 : f32 to vector<2x256xf32>
    %41 = arith.subf %39, %40 : vector<2x256xf32>
    %cst_17 = arith.constant 5.000000e-01 : f32
    %42 = vector.broadcast %cst_17 : f32 to vector<2x256xf32>
    %43 = arith.subf %36, %42 : vector<2x256xf32>
    %cst_18 = arith.constant dense<0.000000e+00> : vector<2xf32>
    %44 = vector.multi_reduction <add>, %41, %cst_18 [1] : vector<2x256xf32> to vector<2xf32>
    %45 = vector.shape_cast %44 : vector<2xf32> to vector<2x1xf32>
    %46 = arith.mulf %41, %41 : vector<2x256xf32>
    %cst_19 = arith.constant dense<0.000000e+00> : vector<2xf32>
    %47 = vector.multi_reduction <add>, %46, %cst_19 [1] : vector<2x256xf32> to vector<2xf32>
    %48 = vector.shape_cast %47 : vector<2xf32> to vector<2x1xf32>
    %cst_20 = arith.constant dense<0.000000e+00> : vector<2xf32>
    %49 = vector.multi_reduction <add>, %43, %cst_20 [1] : vector<2x256xf32> to vector<2xf32>
    %50 = vector.shape_cast %49 : vector<2xf32> to vector<2x1xf32>
    %51 = arith.mulf %43, %43 : vector<2x256xf32>
    %cst_21 = arith.constant dense<0.000000e+00> : vector<2xf32>
    %52 = vector.multi_reduction <add>, %51, %cst_21 [1] : vector<2x256xf32> to vector<2xf32>
    %53 = vector.shape_cast %52 : vector<2xf32> to vector<2x1xf32>
    %54 = tpu.concatenate %45, %48, %50, %53 in 1 : vector<2x1xf32>, vector<2x1xf32>, vector<2x1xf32>, vector<2x1xf32> -> vector<2x4xf32>
    %c0_22 = arith.constant 0 : index
    %c0_23 = arith.constant 0 : index
    %c0_24 = arith.constant 0 : index
    %55 = vector.load %arg11[%c0_22, %c0_23, %c0_24] : memref<1x2x4xf32, #tpu.memory_space<vmem>>, vector<1x2x4xf32>
    %56 = vector.shape_cast %55 : vector<1x2x4xf32> to vector<2x4xf32>
    %57 = vector.shape_cast %54 : vector<2x4xf32> to vector<1x2x4xf32>
    tpu.vector_store %arg11[%c0_22, %c0_23, %c0_24], %57 {strides = array<i32>} : memref<1x2x4xf32, #tpu.memory_space<vmem>>, vector<1x2x4xf32>,
    %58 = vector.extract_strided_slice %1 {offsets = [0, 128], sizes = [4, 128], strides = [1, 1]} : vector<4x256xf32> to vector<4x128xf32>
    %59 = vector.extract_strided_slice %1 {offsets = [0, 0], sizes = [4, 128], strides = [1, 1]} : vector<4x256xf32> to vector<4x128xf32>
    %60 = tpu.concatenate %58, %59 in 1 : vector<4x128xf32>, vector<4x128xf32> -> vector<4x256xf32>
    %61 = vector.extract_strided_slice %36 {offsets = [0, 0], sizes = [1, 256], strides = [1, 1]} : vector<2x256xf32> to vector<1x256xf32>
    %62 = tpu.concatenate %61, %61 in 1 : vector<1x256xf32>, vector<1x256xf32> -> vector<1x512xf32>
    %63 = vector.extract_strided_slice %0 {offsets = [1, 0], sizes = [1, 256], strides = [1, 1]} : vector<4x256xf32> to vector<1x256xf32>
    %64 = vector.extract_strided_slice %60 {offsets = [1, 0], sizes = [1, 256], strides = [1, 1]} : vector<4x256xf32> to vector<1x256xf32>
    %65 = tpu.concatenate %63, %64 in 1 : vector<1x256xf32>, vector<1x256xf32> -> vector<1x512xf32>
    %c0_25 = arith.constant 0 : index
    %c0_26 = arith.constant 0 : index
    %c0_27 = arith.constant 0 : index
    %66 = vector.load %arg5[%c0_25, %c0_26, %c0_27] : memref<4x16x2xf32, #tpu.memory_space<vmem>>, vector<1x16x2xf32>
    %67 = vector.shape_cast %66 : vector<1x16x2xf32> to vector<16x2xf32>
    %68 = vector.extract_strided_slice %67 {offsets = [0, 0], sizes = [16, 1], strides = [1, 1]} : vector<16x2xf32> to vector<16x1xf32>
    %69 = vector.broadcast %68 : vector<16x1xf32> to vector<16x512xf32>
    %70 = vector.broadcast %62 : vector<1x512xf32> to vector<16x512xf32>
    %71 = arith.mulf %69, %70 : vector<16x512xf32>
    %72 = vector.extract_strided_slice %67 {offsets = [0, 1], sizes = [16, 1], strides = [1, 1]} : vector<16x2xf32> to vector<16x1xf32>
    %73 = vector.broadcast %72 : vector<16x1xf32> to vector<16x512xf32>
    %74 = vector.broadcast %65 : vector<1x512xf32> to vector<16x512xf32>
    %75 = arith.mulf %73, %74 : vector<16x512xf32>
    %76 = arith.addf %71, %75 : vector<16x512xf32>
    %c0_28 = arith.constant 0 : index
    %c0_29 = arith.constant 0 : index
    %c0_30 = arith.constant 0 : index
    %77 = vector.load %arg6[%c0_28, %c0_29, %c0_30] : memref<4x16x1xf32, #tpu.memory_space<vmem>>, vector<1x16x1xf32>
    %78 = vector.shape_cast %77 : vector<1x16x1xf32> to vector<16x1xf32>
    %79 = vector.broadcast %78 : vector<16x1xf32> to vector<16x512xf32>
    %80 = arith.addf %76, %79 : vector<16x512xf32>
    %cst_31 = arith.constant 0.000000e+00 : f32
    %81 = vector.broadcast %cst_31 : f32 to vector<16x512xf32>
    %82 = arith.maximumf %80, %81 : vector<16x512xf32>
    %c0_32 = arith.constant 0 : index
    %c0_33 = arith.constant 0 : index
    %c0_34 = arith.constant 0 : index
    %83 = vector.load %arg7[%c0_32, %c0_33, %c0_34] : memref<4x16x16xf32, #tpu.memory_space<vmem>>, vector<1x16x16xf32>
    %84 = vector.shape_cast %83 : vector<1x16x16xf32> to vector<16x16xf32>
    %cst_35 = arith.constant dense<0.000000e+00> : vector<16x512xf32>
    %85 = tpu.matmul %84, %82, %cst_35 {dimension_numbers = #tpu.dot_dimension_numbers<[1], [0], [0], [1], [0, 0, 1, 1], [], []>} : vector<16x16xf32>, vector<16x512xf32>, vector<16x512xf32> -> vector<16x512xf32>
    %c0_36 = arith.constant 0 : index
    %c0_37 = arith.constant 0 : index
    %c0_38 = arith.constant 0 : index
    %86 = vector.load %arg8[%c0_36, %c0_37, %c0_38] : memref<4x16x1xf32, #tpu.memory_space<vmem>>, vector<1x16x1xf32>
    %87 = vector.shape_cast %86 : vector<1x16x1xf32> to vector<16x1xf32>
    %88 = vector.broadcast %87 : vector<16x1xf32> to vector<16x512xf32>
    %89 = arith.addf %85, %88 : vector<16x512xf32>
    %cst_39 = arith.constant 0.000000e+00 : f32
    %90 = vector.broadcast %cst_39 : f32 to vector<16x512xf32>
    %91 = arith.maximumf %89, %90 : vector<16x512xf32>
    %c0_40 = arith.constant 0 : index
    %c0_41 = arith.constant 0 : index
    %c0_42 = arith.constant 0 : index
    %92 = vector.load %arg9[%c0_40, %c0_41, %c0_42] : memref<4x16x1xf32, #tpu.memory_space<vmem>>, vector<1x16x1xf32>
    %93 = vector.shape_cast %92 : vector<1x16x1xf32> to vector<16x1xf32>
    %94 = vector.broadcast %93 : vector<16x1xf32> to vector<16x512xf32>
    %95 = arith.mulf %91, %94 : vector<16x512xf32>
    %cst_43 = arith.constant dense<0.000000e+00> : vector<512xf32>
    %96 = vector.multi_reduction <add>, %95, %cst_43 [0] : vector<16x512xf32> to vector<512xf32>
    %97 = vector.shape_cast %96 : vector<512xf32> to vector<1x512xf32>
    %c0_44 = arith.constant 0 : index
    %c0_45 = arith.constant 0 : index
    %c0_46 = arith.constant 0 : index
    %98 = vector.load %arg10[%c0_44, %c0_45, %c0_46] : memref<4x1x1xf32, #tpu.memory_space<vmem>>, vector<1x1x1xf32>
    %99 = vector.shape_cast %98 : vector<1x1x1xf32> to vector<1x1xf32>
    %100 = vector.broadcast %99 : vector<1x1xf32> to vector<1x512xf32>
    %101 = arith.addf %97, %100 : vector<1x512xf32>
    %102 = vector.extract_strided_slice %101 {offsets = [0, 0], sizes = [1, 256], strides = [1, 1]} : vector<1x512xf32> to vector<1x256xf32>
    %103 = vector.extract_strided_slice %101 {offsets = [0, 256], sizes = [1, 256], strides = [1, 1]} : vector<1x512xf32> to vector<1x256xf32>
    %cst_47 = arith.constant dense<0.000000e+00> : vector<1xf32>
    %104 = vector.multi_reduction <add>, %102, %cst_47 [1] : vector<1x256xf32> to vector<1xf32>
    %105 = vector.shape_cast %104 : vector<1xf32> to vector<1x1xf32>
    %cst_48 = arith.constant dense<0xFF800000> : vector<1xf32>
    %106 = vector.multi_reduction <maximumf>, %103, %cst_48 [1] : vector<1x256xf32> to vector<1xf32>
    %107 = vector.shape_cast %106 : vector<1xf32> to vector<1x1xf32>
    %108 = vector.broadcast %107 : vector<1x1xf32> to vector<1x256xf32>
    %109 = arith.subf %103, %108 : vector<1x256xf32>
    %110 = math.exp %109 : vector<1x256xf32>
    %cst_49 = arith.constant dense<0.000000e+00> : vector<1xf32>
    %111 = vector.multi_reduction <add>, %110, %cst_49 [1] : vector<1x256xf32> to vector<1xf32>
    %112 = vector.shape_cast %111 : vector<1xf32> to vector<1x1xf32>
    %113 = tpu.concatenate %105, %107, %112 in 1 : vector<1x1xf32>, vector<1x1xf32>, vector<1x1xf32> -> vector<1x3xf32>
    %114 = vector.extract_strided_slice %36 {offsets = [1, 0], sizes = [1, 256], strides = [1, 1]} : vector<2x256xf32> to vector<1x256xf32>
    %115 = tpu.concatenate %114, %114 in 1 : vector<1x256xf32>, vector<1x256xf32> -> vector<1x512xf32>
    %116 = vector.extract_strided_slice %0 {offsets = [2, 0], sizes = [1, 256], strides = [1, 1]} : vector<4x256xf32> to vector<1x256xf32>
    %117 = vector.extract_strided_slice %60 {offsets = [2, 0], sizes = [1, 256], strides = [1, 1]} : vector<4x256xf32> to vector<1x256xf32>
    %118 = tpu.concatenate %116, %117 in 1 : vector<1x256xf32>, vector<1x256xf32> -> vector<1x512xf32>
    %c1 = arith.constant 1 : index
    %c0_50 = arith.constant 0 : index
    %c0_51 = arith.constant 0 : index
    %119 = vector.load %arg5[%c1, %c0_50, %c0_51] : memref<4x16x2xf32, #tpu.memory_space<vmem>>, vector<1x16x2xf32>
    %120 = vector.shape_cast %119 : vector<1x16x2xf32> to vector<16x2xf32>
    %121 = vector.extract_strided_slice %120 {offsets = [0, 0], sizes = [16, 1], strides = [1, 1]} : vector<16x2xf32> to vector<16x1xf32>
    %122 = vector.broadcast %121 : vector<16x1xf32> to vector<16x512xf32>
    %123 = vector.broadcast %115 : vector<1x512xf32> to vector<16x512xf32>
    %124 = arith.mulf %122, %123 : vector<16x512xf32>
    %125 = vector.extract_strided_slice %120 {offsets = [0, 1], sizes = [16, 1], strides = [1, 1]} : vector<16x2xf32> to vector<16x1xf32>
    %126 = vector.broadcast %125 : vector<16x1xf32> to vector<16x512xf32>
    %127 = vector.broadcast %118 : vector<1x512xf32> to vector<16x512xf32>
    %128 = arith.mulf %126, %127 : vector<16x512xf32>
    %129 = arith.addf %124, %128 : vector<16x512xf32>
    %c1_52 = arith.constant 1 : index
    %c0_53 = arith.constant 0 : index
    %c0_54 = arith.constant 0 : index
    %130 = vector.load %arg6[%c1_52, %c0_53, %c0_54] : memref<4x16x1xf32, #tpu.memory_space<vmem>>, vector<1x16x1xf32>
    %131 = vector.shape_cast %130 : vector<1x16x1xf32> to vector<16x1xf32>
    %132 = vector.broadcast %131 : vector<16x1xf32> to vector<16x512xf32>
    %133 = arith.addf %129, %132 : vector<16x512xf32>
    %cst_55 = arith.constant 0.000000e+00 : f32
    %134 = vector.broadcast %cst_55 : f32 to vector<16x512xf32>
    %135 = arith.maximumf %133, %134 : vector<16x512xf32>
    %c1_56 = arith.constant 1 : index
    %c0_57 = arith.constant 0 : index
    %c0_58 = arith.constant 0 : index
    %136 = vector.load %arg7[%c1_56, %c0_57, %c0_58] : memref<4x16x16xf32, #tpu.memory_space<vmem>>, vector<1x16x16xf32>
    %137 = vector.shape_cast %136 : vector<1x16x16xf32> to vector<16x16xf32>
    %cst_59 = arith.constant dense<0.000000e+00> : vector<16x512xf32>
    %138 = tpu.matmul %137, %135, %cst_59 {dimension_numbers = #tpu.dot_dimension_numbers<[1], [0], [0], [1], [0, 0, 1, 1], [], []>} : vector<16x16xf32>, vector<16x512xf32>, vector<16x512xf32> -> vector<16x512xf32>
    %c1_60 = arith.constant 1 : index
    %c0_61 = arith.constant 0 : index
    %c0_62 = arith.constant 0 : index
    %139 = vector.load %arg8[%c1_60, %c0_61, %c0_62] : memref<4x16x1xf32, #tpu.memory_space<vmem>>, vector<1x16x1xf32>
    %140 = vector.shape_cast %139 : vector<1x16x1xf32> to vector<16x1xf32>
    %141 = vector.broadcast %140 : vector<16x1xf32> to vector<16x512xf32>
    %142 = arith.addf %138, %141 : vector<16x512xf32>
    %cst_63 = arith.constant 0.000000e+00 : f32
    %143 = vector.broadcast %cst_63 : f32 to vector<16x512xf32>
    %144 = arith.maximumf %142, %143 : vector<16x512xf32>
    %c1_64 = arith.constant 1 : index
    %c0_65 = arith.constant 0 : index
    %c0_66 = arith.constant 0 : index
    %145 = vector.load %arg9[%c1_64, %c0_65, %c0_66] : memref<4x16x1xf32, #tpu.memory_space<vmem>>, vector<1x16x1xf32>
    %146 = vector.shape_cast %145 : vector<1x16x1xf32> to vector<16x1xf32>
    %147 = vector.broadcast %146 : vector<16x1xf32> to vector<16x512xf32>
    %148 = arith.mulf %144, %147 : vector<16x512xf32>
    %cst_67 = arith.constant dense<0.000000e+00> : vector<512xf32>
    %149 = vector.multi_reduction <add>, %148, %cst_67 [0] : vector<16x512xf32> to vector<512xf32>
    %150 = vector.shape_cast %149 : vector<512xf32> to vector<1x512xf32>
    %c1_68 = arith.constant 1 : index
    %c0_69 = arith.constant 0 : index
    %c0_70 = arith.constant 0 : index
    %151 = vector.load %arg10[%c1_68, %c0_69, %c0_70] : memref<4x1x1xf32, #tpu.memory_space<vmem>>, vector<1x1x1xf32>
    %152 = vector.shape_cast %151 : vector<1x1x1xf32> to vector<1x1xf32>
    %153 = vector.broadcast %152 : vector<1x1xf32> to vector<1x512xf32>
    %154 = arith.addf %150, %153 : vector<1x512xf32>
    %155 = vector.extract_strided_slice %154 {offsets = [0, 0], sizes = [1, 256], strides = [1, 1]} : vector<1x512xf32> to vector<1x256xf32>
    %156 = vector.extract_strided_slice %154 {offsets = [0, 256], sizes = [1, 256], strides = [1, 1]} : vector<1x512xf32> to vector<1x256xf32>
    %cst_71 = arith.constant dense<0.000000e+00> : vector<1xf32>
    %157 = vector.multi_reduction <add>, %155, %cst_71 [1] : vector<1x256xf32> to vector<1xf32>
    %158 = vector.shape_cast %157 : vector<1xf32> to vector<1x1xf32>
    %cst_72 = arith.constant dense<0xFF800000> : vector<1xf32>
    %159 = vector.multi_reduction <maximumf>, %156, %cst_72 [1] : vector<1x256xf32> to vector<1xf32>
    %160 = vector.shape_cast %159 : vector<1xf32> to vector<1x1xf32>
    %161 = vector.broadcast %160 : vector<1x1xf32> to vector<1x256xf32>
    %162 = arith.subf %156, %161 : vector<1x256xf32>
    %163 = math.exp %162 : vector<1x256xf32>
    %cst_73 = arith.constant dense<0.000000e+00> : vector<1xf32>
    %164 = vector.multi_reduction <add>, %163, %cst_73 [1] : vector<1x256xf32> to vector<1xf32>
    %165 = vector.shape_cast %164 : vector<1xf32> to vector<1x1xf32>
    %166 = tpu.concatenate %158, %160, %165 in 1 : vector<1x1xf32>, vector<1x1xf32>, vector<1x1xf32> -> vector<1x3xf32>
    %167 = vector.extract_strided_slice %36 {offsets = [0, 0], sizes = [1, 256], strides = [1, 1]} : vector<2x256xf32> to vector<1x256xf32>
    %168 = tpu.concatenate %167, %167 in 1 : vector<1x256xf32>, vector<1x256xf32> -> vector<1x512xf32>
    %169 = vector.extract_strided_slice %0 {offsets = [3, 0], sizes = [1, 256], strides = [1, 1]} : vector<4x256xf32> to vector<1x256xf32>
    %170 = vector.extract_strided_slice %60 {offsets = [3, 0], sizes = [1, 256], strides = [1, 1]} : vector<4x256xf32> to vector<1x256xf32>
    %171 = tpu.concatenate %169, %170 in 1 : vector<1x256xf32>, vector<1x256xf32> -> vector<1x512xf32>
    %c2 = arith.constant 2 : index
    %c0_74 = arith.constant 0 : index
    %c0_75 = arith.constant 0 : index
    %172 = vector.load %arg5[%c2, %c0_74, %c0_75] : memref<4x16x2xf32, #tpu.memory_space<vmem>>, vector<1x16x2xf32>
    %173 = vector.shape_cast %172 : vector<1x16x2xf32> to vector<16x2xf32>
    %174 = vector.extract_strided_slice %173 {offsets = [0, 0], sizes = [16, 1], strides = [1, 1]} : vector<16x2xf32> to vector<16x1xf32>
    %175 = vector.broadcast %174 : vector<16x1xf32> to vector<16x512xf32>
    %176 = vector.broadcast %168 : vector<1x512xf32> to vector<16x512xf32>
    %177 = arith.mulf %175, %176 : vector<16x512xf32>
    %178 = vector.extract_strided_slice %173 {offsets = [0, 1], sizes = [16, 1], strides = [1, 1]} : vector<16x2xf32> to vector<16x1xf32>
    %179 = vector.broadcast %178 : vector<16x1xf32> to vector<16x512xf32>
    %180 = vector.broadcast %171 : vector<1x512xf32> to vector<16x512xf32>
    %181 = arith.mulf %179, %180 : vector<16x512xf32>
    %182 = arith.addf %177, %181 : vector<16x512xf32>
    %c2_76 = arith.constant 2 : index
    %c0_77 = arith.constant 0 : index
    %c0_78 = arith.constant 0 : index
    %183 = vector.load %arg6[%c2_76, %c0_77, %c0_78] : memref<4x16x1xf32, #tpu.memory_space<vmem>>, vector<1x16x1xf32>
    %184 = vector.shape_cast %183 : vector<1x16x1xf32> to vector<16x1xf32>
    %185 = vector.broadcast %184 : vector<16x1xf32> to vector<16x512xf32>
    %186 = arith.addf %182, %185 : vector<16x512xf32>
    %cst_79 = arith.constant 0.000000e+00 : f32
    %187 = vector.broadcast %cst_79 : f32 to vector<16x512xf32>
    %188 = arith.maximumf %186, %187 : vector<16x512xf32>
    %c2_80 = arith.constant 2 : index
    %c0_81 = arith.constant 0 : index
    %c0_82 = arith.constant 0 : index
    %189 = vector.load %arg7[%c2_80, %c0_81, %c0_82] : memref<4x16x16xf32, #tpu.memory_space<vmem>>, vector<1x16x16xf32>
    %190 = vector.shape_cast %189 : vector<1x16x16xf32> to vector<16x16xf32>
    %cst_83 = arith.constant dense<0.000000e+00> : vector<16x512xf32>
    %191 = tpu.matmul %190, %188, %cst_83 {dimension_numbers = #tpu.dot_dimension_numbers<[1], [0], [0], [1], [0, 0, 1, 1], [], []>} : vector<16x16xf32>, vector<16x512xf32>, vector<16x512xf32> -> vector<16x512xf32>
    %c2_84 = arith.constant 2 : index
    %c0_85 = arith.constant 0 : index
    %c0_86 = arith.constant 0 : index
    %192 = vector.load %arg8[%c2_84, %c0_85, %c0_86] : memref<4x16x1xf32, #tpu.memory_space<vmem>>, vector<1x16x1xf32>
    %193 = vector.shape_cast %192 : vector<1x16x1xf32> to vector<16x1xf32>
    %194 = vector.broadcast %193 : vector<16x1xf32> to vector<16x512xf32>
    %195 = arith.addf %191, %194 : vector<16x512xf32>
    %cst_87 = arith.constant 0.000000e+00 : f32
    %196 = vector.broadcast %cst_87 : f32 to vector<16x512xf32>
    %197 = arith.maximumf %195, %196 : vector<16x512xf32>
    %c2_88 = arith.constant 2 : index
    %c0_89 = arith.constant 0 : index
    %c0_90 = arith.constant 0 : index
    %198 = vector.load %arg9[%c2_88, %c0_89, %c0_90] : memref<4x16x1xf32, #tpu.memory_space<vmem>>, vector<1x16x1xf32>
    %199 = vector.shape_cast %198 : vector<1x16x1xf32> to vector<16x1xf32>
    %200 = vector.broadcast %199 : vector<16x1xf32> to vector<16x512xf32>
    %201 = arith.mulf %197, %200 : vector<16x512xf32>
    %cst_91 = arith.constant dense<0.000000e+00> : vector<512xf32>
    %202 = vector.multi_reduction <add>, %201, %cst_91 [0] : vector<16x512xf32> to vector<512xf32>
    %203 = vector.shape_cast %202 : vector<512xf32> to vector<1x512xf32>
    %c2_92 = arith.constant 2 : index
    %c0_93 = arith.constant 0 : index
    %c0_94 = arith.constant 0 : index
    %204 = vector.load %arg10[%c2_92, %c0_93, %c0_94] : memref<4x1x1xf32, #tpu.memory_space<vmem>>, vector<1x1x1xf32>
    %205 = vector.shape_cast %204 : vector<1x1x1xf32> to vector<1x1xf32>
    %206 = vector.broadcast %205 : vector<1x1xf32> to vector<1x512xf32>
    %207 = arith.addf %203, %206 : vector<1x512xf32>
    %208 = vector.extract_strided_slice %207 {offsets = [0, 0], sizes = [1, 256], strides = [1, 1]} : vector<1x512xf32> to vector<1x256xf32>
    %209 = vector.extract_strided_slice %207 {offsets = [0, 256], sizes = [1, 256], strides = [1, 1]} : vector<1x512xf32> to vector<1x256xf32>
    %cst_95 = arith.constant dense<0.000000e+00> : vector<1xf32>
    %210 = vector.multi_reduction <add>, %208, %cst_95 [1] : vector<1x256xf32> to vector<1xf32>
    %211 = vector.shape_cast %210 : vector<1xf32> to vector<1x1xf32>
    %cst_96 = arith.constant dense<0xFF800000> : vector<1xf32>
    %212 = vector.multi_reduction <maximumf>, %209, %cst_96 [1] : vector<1x256xf32> to vector<1xf32>
    %213 = vector.shape_cast %212 : vector<1xf32> to vector<1x1xf32>
    %214 = vector.broadcast %213 : vector<1x1xf32> to vector<1x256xf32>
    %215 = arith.subf %209, %214 : vector<1x256xf32>
    %216 = math.exp %215 : vector<1x256xf32>
    %cst_97 = arith.constant dense<0.000000e+00> : vector<1xf32>
    %217 = vector.multi_reduction <add>, %216, %cst_97 [1] : vector<1x256xf32> to vector<1xf32>
    %218 = vector.shape_cast %217 : vector<1xf32> to vector<1x1xf32>
    %219 = tpu.concatenate %211, %213, %218 in 1 : vector<1x1xf32>, vector<1x1xf32>, vector<1x1xf32> -> vector<1x3xf32>
    %220 = vector.extract_strided_slice %36 {offsets = [1, 0], sizes = [1, 256], strides = [1, 1]} : vector<2x256xf32> to vector<1x256xf32>
    %221 = tpu.concatenate %220, %220 in 1 : vector<1x256xf32>, vector<1x256xf32> -> vector<1x512xf32>
    %222 = vector.extract_strided_slice %0 {offsets = [3, 0], sizes = [1, 256], strides = [1, 1]} : vector<4x256xf32> to vector<1x256xf32>
    %223 = vector.extract_strided_slice %60 {offsets = [3, 0], sizes = [1, 256], strides = [1, 1]} : vector<4x256xf32> to vector<1x256xf32>
    %224 = tpu.concatenate %222, %223 in 1 : vector<1x256xf32>, vector<1x256xf32> -> vector<1x512xf32>
    %c3 = arith.constant 3 : index
    %c0_98 = arith.constant 0 : index
    %c0_99 = arith.constant 0 : index
    %225 = vector.load %arg5[%c3, %c0_98, %c0_99] : memref<4x16x2xf32, #tpu.memory_space<vmem>>, vector<1x16x2xf32>
    %226 = vector.shape_cast %225 : vector<1x16x2xf32> to vector<16x2xf32>
    %227 = vector.extract_strided_slice %226 {offsets = [0, 0], sizes = [16, 1], strides = [1, 1]} : vector<16x2xf32> to vector<16x1xf32>
    %228 = vector.broadcast %227 : vector<16x1xf32> to vector<16x512xf32>
    %229 = vector.broadcast %221 : vector<1x512xf32> to vector<16x512xf32>
    %230 = arith.mulf %228, %229 : vector<16x512xf32>
    %231 = vector.extract_strided_slice %226 {offsets = [0, 1], sizes = [16, 1], strides = [1, 1]} : vector<16x2xf32> to vector<16x1xf32>
    %232 = vector.broadcast %231 : vector<16x1xf32> to vector<16x512xf32>
    %233 = vector.broadcast %224 : vector<1x512xf32> to vector<16x512xf32>
    %234 = arith.mulf %232, %233 : vector<16x512xf32>
    %235 = arith.addf %230, %234 : vector<16x512xf32>
    %c3_100 = arith.constant 3 : index
    %c0_101 = arith.constant 0 : index
    %c0_102 = arith.constant 0 : index
    %236 = vector.load %arg6[%c3_100, %c0_101, %c0_102] : memref<4x16x1xf32, #tpu.memory_space<vmem>>, vector<1x16x1xf32>
    %237 = vector.shape_cast %236 : vector<1x16x1xf32> to vector<16x1xf32>
    %238 = vector.broadcast %237 : vector<16x1xf32> to vector<16x512xf32>
    %239 = arith.addf %235, %238 : vector<16x512xf32>
    %cst_103 = arith.constant 0.000000e+00 : f32
    %240 = vector.broadcast %cst_103 : f32 to vector<16x512xf32>
    %241 = arith.maximumf %239, %240 : vector<16x512xf32>
    %c3_104 = arith.constant 3 : index
    %c0_105 = arith.constant 0 : index
    %c0_106 = arith.constant 0 : index
    %242 = vector.load %arg7[%c3_104, %c0_105, %c0_106] : memref<4x16x16xf32, #tpu.memory_space<vmem>>, vector<1x16x16xf32>
    %243 = vector.shape_cast %242 : vector<1x16x16xf32> to vector<16x16xf32>
    %cst_107 = arith.constant dense<0.000000e+00> : vector<16x512xf32>
    %244 = tpu.matmul %243, %241, %cst_107 {dimension_numbers = #tpu.dot_dimension_numbers<[1], [0], [0], [1], [0, 0, 1, 1], [], []>} : vector<16x16xf32>, vector<16x512xf32>, vector<16x512xf32> -> vector<16x512xf32>
    %c3_108 = arith.constant 3 : index
    %c0_109 = arith.constant 0 : index
    %c0_110 = arith.constant 0 : index
    %245 = vector.load %arg8[%c3_108, %c0_109, %c0_110] : memref<4x16x1xf32, #tpu.memory_space<vmem>>, vector<1x16x1xf32>
    %246 = vector.shape_cast %245 : vector<1x16x1xf32> to vector<16x1xf32>
    %247 = vector.broadcast %246 : vector<16x1xf32> to vector<16x512xf32>
    %248 = arith.addf %244, %247 : vector<16x512xf32>
    %cst_111 = arith.constant 0.000000e+00 : f32
    %249 = vector.broadcast %cst_111 : f32 to vector<16x512xf32>
    %250 = arith.maximumf %248, %249 : vector<16x512xf32>
    %c3_112 = arith.constant 3 : index
    %c0_113 = arith.constant 0 : index
    %c0_114 = arith.constant 0 : index
    %251 = vector.load %arg9[%c3_112, %c0_113, %c0_114] : memref<4x16x1xf32, #tpu.memory_space<vmem>>, vector<1x16x1xf32>
    %252 = vector.shape_cast %251 : vector<1x16x1xf32> to vector<16x1xf32>
    %253 = vector.broadcast %252 : vector<16x1xf32> to vector<16x512xf32>
    %254 = arith.mulf %250, %253 : vector<16x512xf32>
    %cst_115 = arith.constant dense<0.000000e+00> : vector<512xf32>
    %255 = vector.multi_reduction <add>, %254, %cst_115 [0] : vector<16x512xf32> to vector<512xf32>
    %256 = vector.shape_cast %255 : vector<512xf32> to vector<1x512xf32>
    %c3_116 = arith.constant 3 : index
    %c0_117 = arith.constant 0 : index
    %c0_118 = arith.constant 0 : index
    %257 = vector.load %arg10[%c3_116, %c0_117, %c0_118] : memref<4x1x1xf32, #tpu.memory_space<vmem>>, vector<1x1x1xf32>
    %258 = vector.shape_cast %257 : vector<1x1x1xf32> to vector<1x1xf32>
    %259 = vector.broadcast %258 : vector<1x1xf32> to vector<1x512xf32>
    %260 = arith.addf %256, %259 : vector<1x512xf32>
    %261 = vector.extract_strided_slice %260 {offsets = [0, 0], sizes = [1, 256], strides = [1, 1]} : vector<1x512xf32> to vector<1x256xf32>
    %262 = vector.extract_strided_slice %260 {offsets = [0, 256], sizes = [1, 256], strides = [1, 1]} : vector<1x512xf32> to vector<1x256xf32>
    %cst_119 = arith.constant dense<0.000000e+00> : vector<1xf32>
    %263 = vector.multi_reduction <add>, %261, %cst_119 [1] : vector<1x256xf32> to vector<1xf32>
    %264 = vector.shape_cast %263 : vector<1xf32> to vector<1x1xf32>
    %cst_120 = arith.constant dense<0xFF800000> : vector<1xf32>
    %265 = vector.multi_reduction <maximumf>, %262, %cst_120 [1] : vector<1x256xf32> to vector<1xf32>
    %266 = vector.shape_cast %265 : vector<1xf32> to vector<1x1xf32>
    %267 = vector.broadcast %266 : vector<1x1xf32> to vector<1x256xf32>
    %268 = arith.subf %262, %267 : vector<1x256xf32>
    %269 = math.exp %268 : vector<1x256xf32>
    %cst_121 = arith.constant dense<0.000000e+00> : vector<1xf32>
    %270 = vector.multi_reduction <add>, %269, %cst_121 [1] : vector<1x256xf32> to vector<1xf32>
    %271 = vector.shape_cast %270 : vector<1xf32> to vector<1x1xf32>
    %272 = tpu.concatenate %264, %266, %271 in 1 : vector<1x1xf32>, vector<1x1xf32>, vector<1x1xf32> -> vector<1x3xf32>
    %273 = tpu.concatenate %113, %166, %219, %272 in 0 : vector<1x3xf32>, vector<1x3xf32>, vector<1x3xf32>, vector<1x3xf32> -> vector<4x3xf32>
    %c0_122 = arith.constant 0 : index
    %c0_123 = arith.constant 0 : index
    %c0_124 = arith.constant 0 : index
    %274 = vector.load %arg12[%c0_122, %c0_123, %c0_124] : memref<1x4x3xf32, #tpu.memory_space<vmem>>, vector<1x4x3xf32>
    %275 = vector.shape_cast %274 : vector<1x4x3xf32> to vector<4x3xf32>
    %276 = vector.shape_cast %273 : vector<4x3xf32> to vector<1x4x3xf32>
    tpu.vector_store %arg12[%c0_122, %c0_123, %c0_124], %276 {strides = array<i32>} : memref<1x4x3xf32, #tpu.memory_space<vmem>>, vector<1x4x3xf32>,
    return
  }
  func.func @transform_0(%arg0: i32) -> (i32, i32) {
    %c0_i32 = arith.constant 0 : i32
    %c0_i32_0 = arith.constant 0 : i32
    return %c0_i32, %arg0 : i32, i32
  }
  func.func @transform_1(%arg0: i32) -> (i32, i32) {
    %c0_i32 = arith.constant 0 : i32
    %0 = arith.addi %arg0, %c0_i32 : i32
    %c1_i32 = arith.constant 1 : i32
    %1 = arith.cmpi sge, %0, %c1_i32 : i32
    %c1_i32_0 = arith.constant 1 : i32
    %2 = arith.subi %0, %c1_i32_0 : i32
    %3 = arith.select %1, %2, %0 : i32
    %c0_i32_1 = arith.constant 0 : i32
    %c0_i32_2 = arith.constant 0 : i32
    return %c0_i32_1, %3 : i32, i32
  }
  func.func @transform_2(%arg0: i32) -> (i32, i32) {
    %c0_i32 = arith.constant 0 : i32
    %c0_i32_0 = arith.constant 0 : i32
    %c0_i32_1 = arith.constant 0 : i32
    return %c0_i32, %c0_i32_0 : i32, i32
  }
  func.func @transform_3(%arg0: i32) -> (i32, i32) {
    %c0_i32 = arith.constant 0 : i32
    %c0_i32_0 = arith.constant 0 : i32
    %c0_i32_1 = arith.constant 0 : i32
    return %c0_i32, %c0_i32_0 : i32, i32
  }
  func.func @transform_4(%arg0: i32) -> (i32, i32, i32) {
    %c0_i32 = arith.constant 0 : i32
    %c0_i32_0 = arith.constant 0 : i32
    %c0_i32_1 = arith.constant 0 : i32
    %c0_i32_2 = arith.constant 0 : i32
    return %c0_i32, %c0_i32_0, %c0_i32_1 : i32, i32, i32
  }
  func.func @transform_5(%arg0: i32) -> (i32, i32, i32) {
    %c0_i32 = arith.constant 0 : i32
    %c0_i32_0 = arith.constant 0 : i32
    %c0_i32_1 = arith.constant 0 : i32
    %c0_i32_2 = arith.constant 0 : i32
    return %c0_i32, %c0_i32_0, %c0_i32_1 : i32, i32, i32
  }
  func.func @transform_6(%arg0: i32) -> (i32, i32, i32) {
    %c0_i32 = arith.constant 0 : i32
    %c0_i32_0 = arith.constant 0 : i32
    %c0_i32_1 = arith.constant 0 : i32
    %c0_i32_2 = arith.constant 0 : i32
    return %c0_i32, %c0_i32_0, %c0_i32_1 : i32, i32, i32
  }
  func.func @transform_7(%arg0: i32) -> (i32, i32, i32) {
    %c0_i32 = arith.constant 0 : i32
    %c0_i32_0 = arith.constant 0 : i32
    %c0_i32_1 = arith.constant 0 : i32
    %c0_i32_2 = arith.constant 0 : i32
    return %c0_i32, %c0_i32_0, %c0_i32_1 : i32, i32, i32
  }
  func.func @transform_8(%arg0: i32) -> (i32, i32, i32) {
    %c0_i32 = arith.constant 0 : i32
    %c0_i32_0 = arith.constant 0 : i32
    %c0_i32_1 = arith.constant 0 : i32
    %c0_i32_2 = arith.constant 0 : i32
    return %c0_i32, %c0_i32_0, %c0_i32_1 : i32, i32, i32
  }
  func.func @transform_9(%arg0: i32) -> (i32, i32, i32) {
    %c0_i32 = arith.constant 0 : i32
    %c0_i32_0 = arith.constant 0 : i32
    %c0_i32_1 = arith.constant 0 : i32
    %c0_i32_2 = arith.constant 0 : i32
    return %c0_i32, %c0_i32_0, %c0_i32_1 : i32, i32, i32
  }
  func.func @transform_10(%arg0: i32) -> (i32, i32, i32) {
    %c0_i32 = arith.constant 0 : i32
    %c0_i32_0 = arith.constant 0 : i32
    %c0_i32_1 = arith.constant 0 : i32
    return %arg0, %c0_i32, %c0_i32_0 : i32, i32, i32
  }
  func.func @transform_11(%arg0: i32) -> (i32, i32, i32) {
    %c0_i32 = arith.constant 0 : i32
    %c0_i32_0 = arith.constant 0 : i32
    %c0_i32_1 = arith.constant 0 : i32
    return %arg0, %c0_i32, %c0_i32_0 : i32, i32, i32
  }
}

</mosaic_0001>

<bundles_post_ra>
// kernel: _forward_impl.1
= control target key start
LH: loop header
LB: loop body
LE: loop exit
PB: predicated region body
PF: predicated region fallthrough
CT: control target
= control target key end

     0   :  { %17 = vsyncpa [#allocation3], 0  ;;  %s2655_s0 = inlined_call_operand.hbm [shape: f32[4,256], index: 0, kind: input, shape index: {}, may-alias: {0,1}]   ;;  %s2656_s1 = inlined_call_operand.hbm [shape: f32[4,256], index: 1, kind: input, shape index: {}, may-alias: {0,1}]   ;;  %s2657_s2 = inlined_call_operand.hbm [shape: f32[4,2], index: 2, kind: input, shape index: {}]   ;;  %s2658_s3 = inlined_call_operand.hbm [shape: f32[4,2], index: 3, kind: input, shape index: {}]   ;;  %s2659_s4 = inlined_call_operand.hbm [shape: f32[4,16,2], index: 4, kind: input, shape index: {}]   ;;  %s2660_s5 = inlined_call_operand.hbm [shape: f32[4,16,1], index: 5, kind: input, shape index: {}]   ;;  %s2661_s6 = inlined_call_operand.hbm [shape: f32[4,16,16], index: 6, kind: input, shape index: {}]   ;;  %s2662_s7 = inlined_call_operand.hbm [shape: f32[4,16,1], index: 7, kind: input, shape index: {}]   ;;  %s2663_s8 = inlined_call_operand.hbm [shape: f32[4,16,1], index: 8, kind: input, shape index: {}]   ;;  %s2664_s9 = inlined_call_operand.vmem [shape: f32[4,1,1], index: 9, kind: input, shape index: {}]   ;;  %s2665_s10 = inlined_call_operand.vmem [shape: f32[1,2,4], index: 10, kind: output, shape index: {0}]   ;;  %s2666_s11 = inlined_call_operand.vmem [shape: f32[1,4,3], index: 11, kind: output, shape index: {1}]  }
   0x1   :  { %18 = vsyncpa [#allocation5], 0 }
   0x2   :  { %19 = vsyncpa [#allocation8], 0 }
   0x3   :  { %20 = vsyncpa [#allocation11], 0 }
   0x4   :  { %21 = vsyncpa [#allocation14], 0  ;;  %s2034_s17 = smov [#allocation4]   ;;  %s2035_s19 = smov [#allocation7]  }
   0x5   :  { %s44_s18 = sshll.u32 %s2034_s17, 4  ;;  %s64_s20 = sshll.u32 %s2035_s19, 4  ;;  %s45_s18 = int_to_ptr.vmem [resolvable:$true] %s44_s18  ;;  %s65_s20 = int_to_ptr.vmem [resolvable:$true] %s64_s20 }
   0x6   :  { %s1852_s21 = scalar_lea.vmem %s45_s18, 128  ;;  %p1857_p1 = scmp.lt.s32.totalorder %s45_s18, %s45_s18 }
   0x7   :  { %p1853_p0 = scmp.ne.s32.totalorder %s45_s18, %s1852_s21  ;;  %p1858_p2 = scmp.lt.s32.totalorder %s1852_s21, %s1852_s21 }
   0x9   :  { %p1859_p3 = por %p1858_p2, %p1857_p1 }
   0xb   :  { %p1860_p4 = pnand %p1859_p3, %p1853_p0 }
   0xd   :  { %1863 = shalt.err (!%p1860_p4)
}
   0xe   :  { %47 = dma.hbm_to_vmem [thread:$0]  %s2656_s1, 128, %s45_s18, [#allocation5]  }
   0xf   :  { %s1872_s24 = scalar_lea.vmem %s65_s20, 64  ;;  %p1877_p6 = scmp.lt.s32.totalorder %s65_s20, %s65_s20 }
  0x10   :  { %p1873_p5 = scmp.ne.s32.totalorder %s65_s20, %s1872_s24  ;;  %p1878_p7 = scmp.lt.s32.totalorder %s1872_s24, %s1872_s24 }
  0x12   :  { %p1879_p8 = por %p1878_p7, %p1877_p6 }
  0x14   :  { %p1880_p9 = pnand %p1879_p8, %p1873_p5 }
  0x16   :  { %1883 = shalt.err (!%p1880_p9)
}
  0x17   :  { %67 = dma.hbm_to_vmem [thread:$0]  %s2658_s3, 64, %s65_s20, [#allocation8]  }
  0x18   :  { %s2036_s27 = smov [#allocation10]   ;;  %s2037_s29 = smov [#allocation13]  }
  0x19   :  { %s85_s28 = sshll.u32 %s2036_s27, 4  ;;  %s109_s30 = sshll.u32 %s2037_s29, 4  ;;  %s86_s28 = int_to_ptr.vmem [resolvable:$true] %s85_s28  ;;  %s110_s30 = int_to_ptr.vmem [resolvable:$true] %s109_s30 }
  0x1a   :  { %s1892_s12 = scalar_lea.vmem %s86_s28, 1024  ;;  %p1897_p11 = scmp.lt.s32.totalorder %s86_s28, %s86_s28 }
  0x1b   :  { %p1893_p10 = scmp.ne.s32.totalorder %s86_s28, %s1892_s12  ;;  %p1898_p12 = scmp.lt.s32.totalorder %s1892_s12, %s1892_s12 }
  0x1d   :  { %p1899_p13 = por %p1898_p12, %p1897_p11 }
  0x1f   :  { %p1900_p0 = pnand %p1899_p13, %p1893_p10 }
  0x21   :  { %1903 = shalt.err (!%p1900_p0)
}
  0x22   :  { %s2038_s1 = smov 128   ;;  %s2039_s13 = smov 8  }
  0x23   :  { %91 = dma.hbm_to_vmem [thread:$0]  %s2660_s5, 1024, %s86_s28, [#allocation11], %s2038_s1, %s2038_s1, %s2039_s13  }
  0x24   :  { %s1912_s15 = scalar_lea.vmem %s110_s30, 1024  ;;  %p1917_p2 = scmp.lt.s32.totalorder %s110_s30, %s110_s30 }
  0x25   :  { %p1913_p1 = scmp.ne.s32.totalorder %s110_s30, %s1912_s15  ;;  %p1918_p3 = scmp.lt.s32.totalorder %s1912_s15, %s1912_s15 }
  0x27   :  { %p1919_p4 = por %p1918_p3, %p1917_p2 }
  0x29   :  { %p1920_p5 = pnand %p1919_p4, %p1913_p1 }
  0x2b   :  { %1923 = shalt.err (!%p1920_p5)
}
  0x2c   :  { %115 = dma.hbm_to_vmem [thread:$0]  %s2662_s7, 1024, %s110_s30, [#allocation14], %s2038_s1, %s2038_s1, %s2039_s13  }
  0x2d   :  { %s2040_s18 = smov [#allocation2]   ;;  %s2041_s20 = smov [#allocation6]  }
  0x2e   :  { %s28_s19 = sshll.u32 %s2040_s18, 4  ;;  %s54_s21 = sshll.u32 %s2041_s20, 4  ;;  %s29_s19 = int_to_ptr.vmem [resolvable:$true] %s28_s19  ;;  %s55_s21 = int_to_ptr.vmem [resolvable:$true] %s54_s21 }
  0x2f   :  { %s1932_s5 = scalar_lea.vmem %s29_s19, 128  ;;  %p1937_p7 = scmp.lt.s32.totalorder %s29_s19, %s29_s19 }
  0x30   :  { %p1933_p6 = scmp.ne.s32.totalorder %s29_s19, %s1932_s5  ;;  %p1938_p8 = scmp.lt.s32.totalorder %s1932_s5, %s1932_s5 }
  0x32   :  { %p1939_p9 = por %p1938_p8, %p1937_p7 }
  0x34   :  { %p1940_p10 = pnand %p1939_p9, %p1933_p6 }
  0x36   :  { %1943 = shalt.err (!%p1940_p10)
}
  0x37   :  { %31 = dma.hbm_to_vmem [thread:$0]  %s2655_s0, 128, %s29_s19, [#allocation3]  }
  0x38   :  { %s1952_s24 = scalar_lea.vmem %s55_s21, 64  ;;  %p1957_p12 = scmp.lt.s32.totalorder %s55_s21, %s55_s21 }
  0x39   :  { %p1953_p11 = scmp.ne.s32.totalorder %s55_s21, %s1952_s24  ;;  %p1958_p13 = scmp.lt.s32.totalorder %s1952_s24, %s1952_s24 }
  0x3b   :  { %p1959_p0 = por %p1958_p13, %p1957_p12 }
  0x3d   :  { %p1960_p1 = pnand %p1959_p0, %p1953_p11 }
  0x3f   :  { %1963 = shalt.err (!%p1960_p1)
}
  0x40   :  { %57 = dma.hbm_to_vmem [thread:$0]  %s2657_s2, 64, %s55_s21, [#allocation5]  }
  0x41   :  { %s2042_s26 = smov [#allocation9]   ;;  %s2043_s28 = smov [#allocation12]  }
  0x42   :  { %s73_s27 = sshll.u32 %s2042_s26, 4  ;;  %s97_s29 = sshll.u32 %s2043_s28, 4  ;;  %s74_s27 = int_to_ptr.vmem [resolvable:$true] %s73_s27  ;;  %s98_s29 = int_to_ptr.vmem [resolvable:$true] %s97_s29 }
  0x43   :  { %s1972_s30 = scalar_lea.vmem %s74_s27, 1024  ;;  %p1977_p3 = scmp.lt.s32.totalorder %s74_s27, %s74_s27 }
  0x44   :  { %p1973_p2 = scmp.ne.s32.totalorder %s74_s27, %s1972_s30  ;;  %p1978_p4 = scmp.lt.s32.totalorder %s1972_s30, %s1972_s30 }
  0x46   :  { %p1979_p5 = por %p1978_p4, %p1977_p3 }
  0x48   :  { %p1980_p6 = pnand %p1979_p5, %p1973_p2 }
  0x4a   :  { %1983 = shalt.err (!%p1980_p6)
}
  0x4b   :  { %79 = dma.hbm_to_vmem [thread:$0]  %s2659_s4, 1024, %s74_s27, [#allocation8], %s2038_s1, %s2038_s1, %s2039_s13  }
  0x4c   :  { %s1992_s2 = scalar_lea.vmem %s98_s29, 1024  ;;  %p1997_p8 = scmp.lt.s32.totalorder %s98_s29, %s98_s29 }
  0x4d   :  { %p1993_p7 = scmp.ne.s32.totalorder %s98_s29, %s1992_s2  ;;  %p1998_p9 = scmp.lt.s32.totalorder %s1992_s2, %s1992_s2 }
  0x4f   :  { %p1999_p10 = por %p1998_p9, %p1997_p8 }
  0x51   :  { %p2000_p11 = pnand %p1999_p10, %p1993_p7 }
  0x53   :  { %2003 = shalt.err (!%p2000_p11)
}
  0x54   :  { %103 = dma.hbm_to_vmem [thread:$0]  %s2661_s6, 1024, %s98_s29, [#allocation11], %s2038_s1, %s2038_s1, %s2039_s13  }
  0x55   :  { %s2044_s15 = smov [#allocation15]  }
  0x56   :  { %s121_s16 = sshll.u32 %s2044_s15, 4  ;;  %s122_s16 = int_to_ptr.vmem [resolvable:$true] %s121_s16 }
  0x57   :  { %s2012_s17 = scalar_lea.vmem %s122_s16, 1024  ;;  %p2017_p13 = scmp.lt.s32.totalorder %s122_s16, %s122_s16 }
  0x58   :  { %p2013_p12 = scmp.ne.s32.totalorder %s122_s16, %s2012_s17  ;;  %p2018_p0 = scmp.lt.s32.totalorder %s2012_s17, %s2012_s17 }
  0x5a   :  { %p2019_p1 = por %p2018_p0, %p2017_p13 }
  0x5c   :  { %p2020_p2 = pnand %p2019_p1, %p2013_p12 }
  0x5e   :  { %2023 = shalt.err (!%p2020_p2)
}
  0x5f   :  { %127 = dma.hbm_to_vmem [thread:$0]  %s2663_s8, 1024, %s122_s16, [#allocation14], %s2038_s1, %s2038_s1, %s2039_s13  }
  0x60   :  { %2024 = dma.done.wait [#allocation3], 128  }
  0x61   :  { %2025 = vsyncadd [#allocation3], 4294967168 }
  0x62   :  { %2026 = dma.done.wait [#allocation5], 192  }
  0x63   :  { %2027 = vsyncadd [#allocation5], 4294967104 }
  0x64   :  { %2028 = dma.done.wait [#allocation8], 1088  }
  0x65   :  { %2029 = vsyncadd [#allocation8], 4294966208 }
  0x66   :  { %2030 = dma.done.wait [#allocation11], 2048  }
  0x67   :  { %2031 = vsyncadd [#allocation11], 4294965248 }
  0x68   :  { %2032 = dma.done.wait [#allocation14], 2048  }
  0x69   :  { %2033 = vsyncadd [#allocation14], 4294965248  ;;  %v2045_v0 = vmov 0   ;;  %v164_v1 = vld [vmem:[#allocation7] sm:$0xf]  ;;  %v2046_v3 = vmov 1   ;;  %v172_v19 = vlaneseq }
  0x6a   :  { %1817 = vset.pattern.permute.xlu1 %v2045_v0  ;;  %1815 = vset.pattern.permute.xlu0 %v2045_v0  ;;  %v163_v2 = vld [vmem:[#allocation6] sm:$0xf]  ;;  %v329_v4 = vld [vmem:[#allocation9 + $0x8] sm:$0xff]  ;;  %v328_v5 = vld [vmem:[#allocation9] sm:$0xff]  ;;  %v2047_v20 = vmov 0.0   ;;  %vm262_vm0 = vcmask 1040384  }
  0x6b   :  { %182 = vperm.xlu1 %1817, %v164_v1   ;;  %167 = vperm.xlu0 %1815, %v163_v2   ;;  %v393_v6 = vld [vmem:[#allocation10 + $0x8] sm:$0xff]  ;;  %v392_v7 = vld [vmem:[#allocation10] sm:$0xff]  ;;  %v694_v8 = vld [vmem:[#allocation9 + $0x18] sm:$0xff]  ;;  %v2159_v21 = vshrl.u32 %v172_v19, 7  ;;  %vm292_vm1 = vcmask 1041408   ;;  %vm196_vm2 = vcmask 1043456  }
  0x6c   :  { %v693_v9 = vld [vmem:[#allocation9 + $0x10] sm:$0xff]  ;;  %v759_v10 = vld [vmem:[#allocation10 + $0x18] sm:$0xff]  ;;  %v1063_v11 = vld [vmem:[#allocation9 + $0x28] sm:$0xff]  ;;  %505 = vmatprep.mubr.f32.mxu0 %v2047_v20  ;;  %582 = vmatprep.mubr.f32.mxu1 %v2047_v20  ;;  %v2048_v55 = vmov 839922192   ;;  %vm434_vm3 = vcmask 130048  }
  0x6d   :  { %v1062_v12 = vld [vmem:[#allocation9 + $0x20] sm:$0xff]  ;;  %v758_v13 = vld [vmem:[#allocation10 + $0x10] sm:$0xff]  ;;  %v1120_v14 = vld [vmem:[#allocation10 + $0x28] sm:$0xff]  ;;  %v2162_v22 = vsub.s32 0, %v2159_v21  ;;  %v272_v23 = vsub.s32 4, %v2159_v21  ;;  %v2166_v24 = vsub.s32 1, %v2159_v21  ;;  %v170_v56 = vunpack.c.l.s4 %v2048_v55 }
  0x6e   :  { %v1414_v15 = vld [vmem:[#allocation9 + $0x38] sm:$0xff]  ;;  %v1413_v16 = vld [vmem:[#allocation9 + $0x30] sm:$0xff]  ;;  %v1119_v17 = vld [vmem:[#allocation10 + $0x20] sm:$0xff]  ;;  %v282_v25 = vsub.s32 5, %v2159_v21  ;;  %vm317_vm4 = vcmask 7168   ;;  %vm319_vm5 = vcmask 15360  }
  0x6f   :  { %1818 = vset.pattern.permute.xlu1 %v2046_v3  ;;  %1816 = vset.pattern.permute.xlu0 %v2046_v3  ;;  %v1455_v18 = vld [vmem:[#allocation10 + $0x38] sm:$0xff]  ;;  %v2169_v26 = vld [vmem:[#allocation2] sm:$0xff]  ;;  %v1454_v27 = vld [vmem:[#allocation10 + $0x30] sm:$0xff]  ;;  %v171_v58 = vunpack.c.0.s8 %v170_v56  ;;  %v1053_v56 = vsub.s32 3, %v2159_v21  ;;  %vm321_vm6 = vcmask 23552   ;;  %vm323_vm7 = vcmask 25600  }
  0x70   :  { %230 = vperm.xlu1 %1818, %v164_v1   ;;  %216 = vperm.xlu0 %1816, %v163_v2   ;;  %v269_v28 = vrot.slane %v2169_v26, %v2162_v22  ;;  %v273_v29 = vrot.slane %v2169_v26, %v272_v23  ;;  %v2177_v30 = vrot.slane %v2169_v26, %v2166_v24  ;;  %v790_v32 = vld [vmem:[#allocation13 + $0x10] sm:$0xff]  ;;  %v791_v35 = vld [vmem:[#allocation13 + $0x18] sm:$0xff]  ;;  %v1151_v38 = vld [vmem:[#allocation13 + $0x20] sm:$0xff]  ;;  %vm1758_vm8 = vcmask 1042432  }
  0x71   :  { %v2180_v31 = vrot.slane %v2169_v26, %v282_v25  ;;  %v1152_v41 = vld [vmem:[#allocation13 + $0x28] sm:$0xff]  ;;  %v422_v43 = vld [vmem:[#allocation13] sm:$0xff]  ;;  %v1486_v45 = vld [vmem:[#allocation13 + $0x30] sm:$0xff]  ;;  %v174_v60 = vsub.s32 %v171_v58, %v2159_v21  ;;  %vm1760_vm9 = vcmask 19456  }
  0x72   :  { %v286_v33 = vsel %vm262_vm0, %v269_v28, %v2177_v30  ;;  %v423_v44 = vld [vmem:[#allocation13 + $0x8] sm:$0xff]  ;;  %v1487_v46 = vld [vmem:[#allocation13 + $0x38] sm:$0xff]  ;;  %v971_v48 = vld [vmem:[#allocation15 + $0x10] sm:$0xff] }
  0x73   :  { %v287_v34 = vsel %vm262_vm0, %v273_v29, %v2180_v31  ;;  %v2186_v36 = vadd.f32 -0.5, %v286_v33  ;;  %v972_v47 = vld [vmem:[#allocation15 + $0x18] sm:$0xff]  ;;  %v1332_v49 = vld [vmem:[#allocation15 + $0x20] sm:$0xff]  ;;  %v1333_v51 = vld [vmem:[#allocation15 + $0x28] sm:$0xff] }
  0x74   :  { %1819 = vset.pattern.permute.xlu1 %v2045_v0  ;;  %357 = vperm.xlu0 %1816, %v329_v4   ;;  %v2188_v37 = vadd.f32 -0.5, %v287_v34  ;;  %v1668_v50 = vld [vmem:[#allocation15 + $0x38] sm:$0xff]  ;;  %v1794_v52 = vld [vmem:[%s2664_s9 + $0x2] sm:$0x1]  ;;  %v603_v53 = vld [vmem:[#allocation15] sm:$0xff] }
  0x75   :  { %337 = vperm.xlu1 %1819, %v329_v4   ;;  %v293_v39 = vsel %vm292_vm1, %v2186_v36, 0.0  ;;  %v1799_v54 = vld [vmem:[%s2664_s9 + $0x3] sm:$0x1]  ;;  %v1667_v59 = vld [vmem:[#allocation15 + $0x30] sm:$0xff]  ;;  %v1789_v61 = vld [vmem:[%s2664_s9 + $0x1] sm:$0x1] }
  0x76   :  { %v294_v40 = vsel %vm292_vm1, %v2188_v37, 0.0  ;;  %v604_v57 = vld [vmem:[#allocation15 + $0x8] sm:$0xff] }
  0x77   :  { %v295_v42 = vadd.f32 %v294_v40, %v293_v39  ;;  %v651_v1 = vld [vmem:[%s2664_s9] sm:$0x1] }
  0x78   :  { %353 = vperm.xlu0 %1816, %v328_v5  }
  0x79   :  { %332 = vperm.xlu1 %1819, %v328_v5  }
  0x7c   :  { %1820 = vset.pattern.permute.xlu0 %v2045_v0 }
  0x7d   :  { %401 = vperm.xlu1 %1819, %v393_v6   ;;  %396 = vperm.xlu0 %1820, %v392_v7  }
  0x81   :  { %702 = vperm.xlu1 %1819, %v694_v8   ;;  %697 = vperm.xlu0 %1820, %v693_v9  }
  0x85   :  { %1821 = vset.pattern.permute.xlu1 %v2046_v3  ;;  %767 = vperm.xlu0 %1820, %v759_v10  }
  0x86   :  { %722 = vperm.xlu1 %1821, %v694_v8  }
  0x89   :  { %1071 = vperm.xlu0 %1820, %v1063_v11  }
  0x8a   :  { %718 = vperm.xlu1 %1821, %v693_v9  }
  0x8d   :  { %1066 = vperm.xlu0 %1820, %v1062_v12  }
  0x8e   :  { %1822 = vset.pattern.permute.xlu1 %v2045_v0 }
  0x8f   :  { %762 = vperm.xlu1 %1822, %v758_v13  }
  0x91   :  { %1128 = vperm.xlu0 %1820, %v1120_v14  }
  0x93   :  { %1823 = vset.pattern.permute.xlu1 %v2046_v3 }
  0x94   :  { %1083 = vperm.xlu1 %1823, %v1063_v11  }
  0x95   :  { %1422 = vperm.xlu0 %1820, %v1414_v15  }
  0x98   :  { %1079 = vperm.xlu1 %1823, %v1062_v12  }
  0x99   :  { %1417 = vperm.xlu0 %1820, %v1413_v16  }
  0x9c   :  { %1824 = vset.pattern.permute.xlu1 %v2045_v0 }
  0x9d   :  { %1123 = vperm.xlu1 %1824, %v1119_v17   ;;  %1463 = vperm.xlu0 %1820, %v1455_v18  }
  0xa1   :  { %1825 = vset.pattern.permute.xlu1 %v2046_v3 }
  0xa2   :  { %1434 = vperm.xlu1 %1825, %v1414_v15  }
  0xa6   :  { %1430 = vperm.xlu1 %1825, %v1413_v16  }
  0xaa   :  { %1826 = vset.pattern.permute.xlu1 %v2045_v0 }
  0xab   :  { %1458 = vperm.xlu1 %1826, %v1454_v27  }
  0xaf   :  { %794 = vperm.xlu1 %1826, %v790_v32  }
  0xb3   :  { %799 = vperm.xlu1 %1826, %v791_v35  }
  0xb7   :  { %1155 = vperm.xlu1 %1826, %v1151_v38  }
  0xbb   :  { %1160 = vperm.xlu1 %1826, %v1152_v41  }
  0xbc   :  { %296 = vadd.xlane.f32.xlu0 %v295_v42 }
  0xbf   :  { %426 = vperm.xlu1 %1826, %v422_v43  }
  0xc3   :  { %431 = vperm.xlu1 %1826, %v423_v44  }
  0xc7   :  { %1490 = vperm.xlu1 %1826, %v1486_v45  }
  0xcb   :  { %1495 = vperm.xlu1 %1826, %v1487_v46  }
  0xcf   :  { %980 = vperm.xlu1 %1826, %v972_v47  }
  0xd2   :  { %975 = vperm.xlu0 %1820, %v971_v48   ;;  %v684_v48 = vsub.s32 2, %v2159_v21 }
  0xd3   :  { %1336 = vperm.xlu1 %1826, %v1332_v49  }
  0xd6   :  { %1676 = vperm.xlu0 %1820, %v1668_v50  }
  0xd7   :  { %1341 = vperm.xlu1 %1826, %v1333_v51   ;;  %v162_v51 = vld [vmem:[#allocation4] sm:$0xff] }
  0xda   :  { %1384 = vperm.xlu0 %1820, %v1794_v52   ;;  %v688_v52 = vsub.s32 6, %v2159_v21 }
  0xdb   :  { %607 = vperm.xlu1 %1826, %v603_v53  }
  0xde   :  { %1719 = vperm.xlu0 %1820, %v1799_v54  }
  0xdf   :  { %612 = vperm.xlu1 %1826, %v604_v57   ;;  %v1057_v57 = vsub.s32 7, %v2159_v21 }
  0xe3   :  { %1671 = vperm.xlu1 %1826, %v1667_v59  }
  0xe6   :  { %v168_v62 = vpop.permute.xlu0 %167  ;;  %v183_v63 = vpop.permute.xlu1 %182 }
  0xe7   :  { %v175_v0 = vrot.slane %v168_v62, %v174_v60  ;;  %1023 = vperm.xlu1 %1826, %v1789_v61   ;;  %v190_v8 = vrot.slane %v183_v63, %v174_v60  ;;  %v326_v61 = vcombine.high %v162_v51, %v162_v51  ;;  %v685_v62 = vrot.slane %v2169_v26, %v684_v48 }
  0xe9   :  { %v177_v2 = vsub.f32 %v2169_v26, %v175_v0 }
  0xeb   :  { %v178_v3 = vmax.f32 %v177_v2, 0.0  ;;  %654 = vperm.xlu1 %1826, %v651_v1   ;;  %v217_v4 = vpop.permute.xlu0 %216  ;;  %v231_v5 = vpop.permute.xlu1 %230  ;;  %v689_v2 = vrot.slane %v2169_v26, %v688_v52 }
  0xec   :  { %v224_v6 = vrot.slane %v217_v4, %v174_v60  ;;  %v238_v18 = vrot.slane %v231_v5, %v174_v60  ;;  %v1054_v4 = vrot.slane %v2169_v26, %v1053_v56  ;;  %v1058_v5 = vrot.slane %v2169_v26, %v1057_v57 }
  0xed   :  { %v179_v7 = vmin.f32 %v178_v3, 1.0 }
  0xee   :  { %v226_v9 = vsub.f32 %v2169_v26, %v224_v6  ;;  %v736_v26 = vrot.slane %v326_v61, %v684_v48 }
  0xef   :  { %v192_v10 = vmul.f32 %v190_v8, %v179_v7  ;;  %v2209_v11 = vpop.permute.xlu0 %357  ;;  %v363_v8 = vrot.slane %v2177_v30, %v2166_v24 }
  0xf0   :  { %v227_v12 = vmax.f32 %v226_v9, 0.0  ;;  %v2211_v13 = vpop.permute.xlu1 %337 }
  0xf1   :  { %v194_v14 = vcombine.high %v192_v10, %v192_v10  ;;  %v197_v15 = vsel %vm196_vm2, %v192_v10, 0.0  ;;  %v371_v10 = vrot.slane %v326_v61, %v2166_v24 }
  0xf2   :  { %v198_v16 = vrot.slane %v197_v15, 4  ;;  %v228_v17 = vmin.f32 %v227_v12, 1.0  ;;  %v367_v12 = vrot.slane %v2180_v31, %v2166_v24  ;;  %v380_v31 = vmul.f32 %v363_v8, %v2209_v11 }
  0xf3   :  { %v204_v19 = vsel %vm196_vm2, %v194_v14, 0.0  ;;  %v2215_v23 = vpop.permute.xlu0 %353  ;;  %v375_v14 = vrot.slane %v162_v51, %v2166_v24 }
  0xf4   :  { %v199_v25 = vadd.f32 %v198_v16, %v197_v15  ;;  %v205_v27 = vrot.slane %v204_v19, 4  ;;  %v240_v28 = vmul.f32 %v238_v18, %v228_v17  ;;  %v2217_v29 = vpop.permute.xlu1 %332  ;;  %v728_v15 = vrot.slane %v685_v62, %v684_v48 }
  0xf5   :  { %v379_v57 = vmul.f32 %v375_v14, %v2215_v23 }
  0xf6   :  { %v200_v32 = vrot.slane %v199_v25, 2  ;;  %v206_v33 = vadd.f32 %v205_v27, %v204_v19  ;;  %v242_v34 = vcombine.high %v240_v28, %v240_v28  ;;  %v244_v35 = vsel %vm196_vm2, %v240_v28, 0.0 }
  0xf7   :  { %v245_v38 = vrot.slane %v244_v35, 4  ;;  %v732_v19 = vrot.slane %v689_v2, %v684_v48  ;;  %v2245_v28 = vrot.slane %v1054_v4, %v1053_v56 }
  0xf8   :  { %v201_v39 = vadd.f32 %v200_v32, %v199_v25  ;;  %v207_v40 = vrot.slane %v206_v33, 2  ;;  %v251_v41 = vsel %vm196_vm2, %v242_v34, 0.0  ;;  %v2221_v42 = vpop.permute.xlu1 %401  ;;  %v2223_v43 = vpop.permute.xlu0 %396  ;;  %v740_v25 = vrot.slane %v162_v51, %v684_v48 }
  0xf9   :  { %v246_v44 = vadd.f32 %v245_v38, %v244_v35  ;;  %v252_v45 = vrot.slane %v251_v41, 4  ;;  %v2247_v32 = vrot.slane %v1058_v5, %v1053_v56  ;;  %v2249_v35 = vrot.slane %v326_v61, %v1053_v56 }
  0xfa   :  { %v202_v46 = vrot.slane %v201_v39, 1  ;;  %v208_v47 = vadd.f32 %v207_v40, %v206_v33  ;;  %v382_v38 = vmul.f32 %v371_v10, %v2209_v11  ;;  %v2253_v40 = vrot.slane %v162_v51, %v1053_v56 }
  0xfb   :  { %v247_v49 = vrot.slane %v246_v44, 2  ;;  %v253_v50 = vadd.f32 %v252_v45, %v251_v41  ;;  %v381_v41 = vmul.f32 %v367_v12, %v2209_v11  ;;  %v378_v56 = vmul.f32 %v371_v10, %v2215_v23 }
  0xfc   :  { %v209_v53 = vrot.slane %v208_v47, 1  ;;  %v2227_v54 = vpop.permute.xlu1 %702  ;;  %v2229_v55 = vpop.permute.xlu0 %697  ;;  %v203_v58 = vadd.f32 %v202_v46, %v201_v39 }
  0xfd   :  { %v248_v59 = vadd.f32 %v247_v49, %v246_v44  ;;  %v254_v60 = vrot.slane %v253_v50, 2  ;;  %v376_v49 = vmul.f32 %v363_v8, %v2215_v23 }
  0xfe   :  { %v210_v63 = vadd.f32 %v209_v53, %v208_v47  ;;  %v211_v6 = vmax.f32 %v203_v58, 0.0  ;;  %v383_v47 = vmul.f32 %v375_v14, %v2209_v11 }
  0xff   :  { %v249_v0 = vrot.slane %v248_v59, 1  ;;  %v255_v1 = vadd.f32 %v254_v60, %v253_v50  ;;  %v377_v50 = vmul.f32 %v367_v12, %v2215_v23 }
 0x100   :  { %v2235_v3 = vpop.permute.xlu0 %767  ;;  %v212_v16 = vmax.f32 %v210_v63, 0.0  ;;  %v213_v30 = vmin.f32 %v211_v6, 1.0 }
 0x101   :  { %v250_v7 = vadd.f32 %v249_v0, %v248_v59  ;;  %v256_v21 = vrot.slane %v255_v1, 1  ;;  %v723_v9 = vpop.permute.xlu1 %722 }
 0x102   :  { %v214_v44 = vmin.f32 %v212_v16, 1.0  ;;  %v745_v11 = vmul.f32 %v728_v15, %v723_v9  ;;  %v2277_v61 = vmul.f32 %v732_v19, %v723_v9  ;;  %v747_v23 = vmul.f32 %v736_v26, %v723_v9 }
 0x103   :  { %v257_v17 = vadd.f32 %v256_v21, %v255_v1  ;;  %v258_v18 = vmax.f32 %v250_v7, 0.0  ;;  %v2287_v1 = vmul.f32 %v740_v25, %v723_v9 }
 0x104   :  { %v1072_v27 = vpop.permute.xlu0 %1071 }
 0x105   :  { %v259_v33 = vmax.f32 %v257_v17, 0.0  ;;  %v260_v34 = vmin.f32 %v258_v18, 1.0  ;;  %v719_v39 = vpop.permute.xlu1 %718 }
 0x106   :  { %v741_v4 = vmul.f32 %v728_v15, %v719_v39  ;;  %v2290_v5 = vmul.f32 %v732_v19, %v719_v39  ;;  %v743_v6 = vmul.f32 %v736_v26, %v719_v39 }
 0x107   :  { %v261_v45 = vmin.f32 %v259_v33, 1.0  ;;  %v2257_v46 = vsel %vm262_vm0, %v213_v30, %v260_v34 }
 0x108   :  { %v343_v48 = vrot.slane %v2257_v46, %v2162_v22  ;;  %v2266_v51 = vrot.slane %v2257_v46, %v2166_v24  ;;  %v1067_v52 = vpop.permute.xlu0 %1066 }
 0x109   :  { %v2269_v53 = vsel %vm262_vm0, %v214_v44, %v261_v45 }
 0x10a   :  { %v347_v58 = vrot.slane %v2269_v53, %v2162_v22  ;;  %v350_v59 = vmul.f32 %v343_v48, %v2211_v13  ;;  %v348_v60 = vmul.f32 %v343_v48, %v2217_v29  ;;  %v2279_v62 = vpop.permute.xlu1 %762  ;;  %v2283_v63 = vrot.slane %v2269_v53, %v2166_v24 }
 0x10b   :  { %v713_v0 = vmul.f32 %v2266_v51, %v2229_v55  ;;  %v715_v21 = vmul.f32 %v2266_v51, %v2227_v54  ;;  %v1076_v8 = vmul.f32 %v1072_v27, %v343_v48  ;;  %v2296_v24 = vmul.f32 %v740_v25, %v719_v39 }
 0x10c   :  { %v349_v2 = vmul.f32 %v347_v58, %v2217_v29  ;;  %v2292_v7 = vpop.permute.xlu0 %1128  ;;  %v2298_v10 = vmul.f32 %v1067_v52, %v343_v48  ;;  %v351_v12 = vmul.f32 %v347_v58, %v2211_v13  ;;  %v388_v9 = vadd.f32 %v380_v31, %v350_v59 }
 0x10d   :  { %v390_v14 = vadd.f32 %v382_v38, %v350_v59  ;;  %v384_v16 = vadd.f32 %v376_v49, %v348_v60  ;;  %v386_v29 = vadd.f32 %v378_v56, %v348_v60  ;;  %v716_v15 = vmul.f32 %v2283_v63, %v2227_v54 }
 0x10e   :  { %v749_v17 = vadd.f32 %v741_v4, %v713_v0  ;;  %v751_v18 = vadd.f32 %v743_v6, %v713_v0  ;;  %v385_v26 = vadd.f32 %v377_v50, %v349_v2  ;;  %v387_v30 = vadd.f32 %v379_v57, %v349_v2 }
 0x10f   :  { %v1084_v19 = vpop.permute.xlu1 %1083  ;;  %v2305_v25 = vmul.f32 %v2283_v63, %v2229_v55  ;;  %v753_v13 = vadd.f32 %v745_v11, %v715_v21  ;;  %v755_v31 = vadd.f32 %v747_v23, %v715_v21  ;;  %v2308_v38 = vmul.f32 %v1072_v27, %v347_v58 }
 0x110   :  { %v1106_v33 = vmul.f32 %v2245_v28, %v1084_v19  ;;  %v1423_v34 = vpop.permute.xlu0 %1422  ;;  %v1108_v39 = vmul.f32 %v2249_v35, %v1084_v19  ;;  %v2311_v44 = vmul.f32 %v1067_v52, %v347_v58  ;;  %v2314_v54 = vmul.f32 %v2247_v32, %v1084_v19 }
 0x111   :  { %v389_v45 = vadd.f32 %v381_v41, %v351_v12  ;;  %v391_v48 = vadd.f32 %v383_v47, %v351_v12  ;;  %v2317_v55 = vadd.f32 %v2279_v62, %v749_v17  ;;  %v2320_v49 = vadd.f32 %v2279_v62, %v751_v18 }
 0x112   :  { %v2323_v50 = vmul.f32 %v2253_v40, %v1084_v19  ;;  %v2326_v27 = vmul.f32 %v1423_v34, %v2266_v51  ;;  %v2328_v56 = vadd.f32 %v1106_v33, %v1076_v8  ;;  %v2331_v57 = vmul.f32 %v1423_v34, %v2283_v63 }
 0x113   :  { %v1080_v52 = vpop.permute.xlu1 %1079  ;;  %v408_v41 = vadd.f32 %v2221_v42, %v388_v9  ;;  %v410_v47 = vadd.f32 %v2221_v42, %v390_v14  ;;  %v2335_v11 = vadd.f32 %v1108_v39, %v1076_v8  ;;  %v409_v60 = vadd.f32 %v2221_v42, %v389_v45 }
 0x114   :  { %v1102_v58 = vmul.f32 %v2245_v28, %v1080_v52  ;;  %v1418_v59 = vpop.permute.xlu0 %1417  ;;  %v411_v0 = vadd.f32 %v2221_v42, %v391_v48  ;;  %v2341_v23 = vmul.f32 %v2247_v32, %v1080_v52  ;;  %v1104_v2 = vmul.f32 %v2249_v35, %v1080_v52 }
 0x115   :  { %v405_v4 = vadd.f32 %v2223_v43, %v385_v26  ;;  %v407_v6 = vadd.f32 %v2223_v43, %v387_v30  ;;  %v417_v21 = vmax.f32 %v409_v60, 0.0  ;;  %v404_v8 = vadd.f32 %v2223_v43, %v384_v16 }
 0x116   :  { %v419_v12 = vmax.f32 %v411_v0, 0.0  ;;  %v406_v9 = vadd.f32 %v2223_v43, %v386_v29  ;;  %v2349_v14 = vmul.f32 %v2253_v40, %v1080_v52  ;;  %v2352_v42 = vmul.f32 %v1418_v59, %v2266_v51  ;;  %v420_v51 = vld [vmem:[#allocation12] sm:$0xff] }
 0x117   :  { %v416_v17 = vmax.f32 %v408_v41, 0.0  ;;  %v418_v18 = vmax.f32 %v410_v47, 0.0  ;;  %469 = vmatprep.subr.mxu0 %v417_v21  ;;  %v413_v26 = vmax.f32 %v405_v4, 0.0  ;;  %v415_v30 = vmax.f32 %v407_v6, 0.0 }
 0x118   :  { %v2354_v19 = vpop.permute.xlu1 %1123  ;;  %546 = vmatprep.subr.mxu1 %v419_v12  ;;  %v754_v33 = vadd.f32 %v2277_v61, %v716_v15  ;;  %v756_v16 = vadd.f32 %v2287_v1, %v716_v15  ;;  %v412_v43 = vmax.f32 %v404_v8, 0.0  ;;  %v414_v29 = vmax.f32 %v406_v9, 0.0 }
 0x119   :  { %470 = vmatpush1.msra.mxu0 %v416_v17  ;;  %547 = vmatpush1.msra.mxu1 %v418_v18  ;;  %v1110_v34 = vadd.f32 %v1102_v58, %v2298_v10  ;;  %v774_v39 = vadd.f32 %v2235_v3, %v753_v13  ;;  %v776_v52 = vadd.f32 %v2235_v3, %v755_v31  ;;  %v2364_v61 = vadd.f32 -0.5, %v2257_v46 }
 0x11a   :  { %471 = vmatprep.subr.mxu0 %v413_v26  ;;  %548 = vmatprep.subr.mxu1 %v415_v30  ;;  %v775_v45 = vadd.f32 %v2235_v3, %v754_v33  ;;  %v777_v48 = vadd.f32 %v2235_v3, %v756_v16  ;;  %v778_v1 = vmax.f32 %v2317_v55, 0.0  ;;  %v2368_v15 = vmul.f32 %v1418_v59, %v2283_v63 }
 0x11b   :  { %472 = vmatpush1.msra.mxu0 %v412_v43  ;;  %549 = vmatpush1.msra.mxu1 %v414_v29  ;;  %v1112_v13 = vadd.f32 %v1104_v2, %v2298_v10  ;;  %v750_v41 = vadd.f32 %v2290_v5, %v2305_v25  ;;  %v782_v46 = vmax.f32 %v774_v39, 0.0  ;;  %v752_v55 = vadd.f32 %v2296_v24, %v2305_v25  ;;  %v421_v10 = vld [vmem:[#allocation12 + $0x8] sm:$0xff] }
 0x11c   :  { %1781 = vmatmul.mubr.msk.f32.vlgmr.msra.gmra.mxu0 %vm434_vm3, %v420_v51  ;;  %1783 = vmatmul.mubr.msk.f32.vlgmr.msra.gmra.mxu1 %vm434_vm3, %v420_v51  ;;  %v783_v3 = vmax.f32 %v775_v45, 0.0  ;;  %v785_v31 = vmax.f32 %v777_v48, 0.0  ;;  %v784_v63 = vmax.f32 %v776_v52, 0.0  ;;  %v1115_v5 = vadd.f32 %v2314_v54, %v2308_v38 }
 0x11d   :  { %v1435_v47 = vpop.permute.xlu1 %1434  ;;  %v771_v58 = vadd.f32 %v2279_v62, %v750_v41  ;;  %511 = vmatprep.mubr.f32.mxu0 %v2047_v20  ;;  %588 = vmatprep.mubr.f32.mxu1 %v2047_v20  ;;  %v1117_v59 = vadd.f32 %v2323_v50, %v2308_v38  ;;  %v780_v60 = vmax.f32 %v2320_v49, 0.0  ;;  %v2386_v0 = vadd.f32 %v2354_v19, %v1110_v34  ;;  %v1464_v34 = vpop.permute.xlu0 %1463 }
 0x11e   :  { %836 = vmatprep.subr.mxu0 %v783_v3  ;;  %913 = vmatprep.subr.mxu1 %v785_v31  ;;  %v773_v24 = vadd.f32 %v2279_v62, %v752_v55  ;;  %v1441_v25 = vmul.f32 %v1435_v47, %v2245_v28  ;;  %v1136_v4 = vadd.f32 %v2292_v7, %v1115_v5  ;;  %v1780_v17 = vadd.f32 -0.5, %v2269_v53 }
 0x11f   :  { %837 = vmatpush1.msra.mxu0 %v782_v46  ;;  %914 = vmatpush1.msra.mxu1 %v784_v63  ;;  %v779_v2 = vmax.f32 %v771_v58, 0.0  ;;  %v1138_v54 = vadd.f32 %v2292_v7, %v1117_v59  ;;  %v1443_v38 = vmul.f32 %v1435_v47, %v2249_v35  ;;  %v2394_v49 = vadd.f32 %v2354_v19, %v1112_v13 }
 0x120   :  { %v781_v50 = vmax.f32 %v773_v24, 0.0  ;;  %1782 = vmatmul.mubr.msk.f32.gmra.mxu0 %vm434_vm3, %v421_v10  ;;  %1784 = vmatmul.mubr.msk.f32.gmra.mxu1 %vm434_vm3, %v421_v10  ;;  %v1442_v62 = vmul.f32 %v1435_v47, %v2247_v32  ;;  %v1135_v6 = vadd.f32 %v2292_v7, %v2328_v56  ;;  %v1144_v12 = vmax.f32 %v1136_v4, 0.0  ;;  %v787_v56 = vld [vmem:[#allocation12 + $0x10] sm:$0xff] }
 0x121   :  { %v1431_v21 = vpop.permute.xlu1 %1430  ;;  %838 = vmatprep.subr.mxu0 %v779_v2  ;;  %v1444_v8 = vmul.f32 %v1435_v47, %v2253_v40  ;;  %872 = vmatprep.mubr.f32.mxu0 %v2047_v20  ;;  %v1137_v9 = vadd.f32 %v2292_v7, %v2335_v11  ;;  %v1146_v18 = vmax.f32 %v1138_v54, 0.0  ;;  %v1449_v26 = vadd.f32 %v1441_v25, %v2326_v27 }
 0x122   :  { %915 = vmatprep.subr.mxu1 %v781_v50  ;;  %839 = vmatpush1.msra.mxu0 %v778_v1  ;;  %v1451_v30 = vadd.f32 %v1443_v38, %v2326_v27  ;;  %v1437_v33 = vmul.f32 %v1431_v21, %v2245_v28  ;;  %v1143_v16 = vmax.f32 %v1135_v6, 0.0  ;;  %v1438_v43 = vmul.f32 %v1431_v21, %v2247_v32  ;;  %v1149_v50 = vld [vmem:[#allocation12 + $0x28] sm:$0xff]  ;;  %v1484_v6 = vld [vmem:[#allocation12 + $0x38] sm:$0xff] }
 0x123   :  { %916 = vmatpush1.msra.mxu1 %v780_v60  ;;  %1197 = vmatprep.subr.mxu0 %v1144_v12  ;;  %v1111_v7 = vadd.f32 %v2341_v23, %v2311_v44  ;;  %v1113_v53 = vadd.f32 %v2349_v14, %v2311_v44  ;;  %v1145_v11 = vmax.f32 %v1137_v9, 0.0  ;;  %v1439_v27 = vmul.f32 %v1431_v21, %v2249_v35 }
 0x124   :  { %1274 = vmatprep.subr.mxu1 %v1146_v18  ;;  %949 = vmatprep.mubr.f32.mxu1 %v2047_v20  ;;  %v1440_v29 = vmul.f32 %v1431_v21, %v2253_v40  ;;  %v1450_v28 = vadd.f32 %v1442_v62, %v2331_v57  ;;  %v1452_v44 = vadd.f32 %v1444_v8, %v2331_v57  ;;  %v1139_v14 = vmax.f32 %v2386_v0, 0.0  ;;  %v788_v57 = vld [vmem:[#allocation12 + $0x18] sm:$0xff]  ;;  %v1148_v0 = vld [vmem:[#allocation12 + $0x20] sm:$0xff]  ;;  %v1483_v62 = vld [vmem:[#allocation12 + $0x30] sm:$0xff] }
 0x125   :  { %1785 = vmatmul.mubr.msk.f32.vlgmr.msra.gmra.mxu0 %vm434_vm3, %v787_v56  ;;  %1787 = vmatmul.mubr.msk.f32.vlgmr.msra.gmra.mxu1 %vm434_vm3, %v787_v56  ;;  %v1132_v32 = vadd.f32 %v2354_v19, %v1111_v7  ;;  %v1134_v23 = vadd.f32 %v2354_v19, %v1113_v53  ;;  %v1141_v51 = vmax.f32 %v2394_v49, 0.0  ;;  %v305_v40 = vsel %vm292_vm1, %v2364_v61, 0.0 }
 0x126   :  { %1198 = vmatpush1.msra.mxu0 %v1143_v16  ;;  %1275 = vmatpush1.msra.mxu1 %v1145_v11  ;;  %v1471_v35 = vadd.f32 %v1464_v34, %v1450_v28  ;;  %v1473_v48 = vadd.f32 %v1464_v34, %v1452_v44  ;;  %v306_v19 = vsel %vm292_vm1, %v1780_v17, 0.0  ;;  %v1459_v52 = vpop.permute.xlu1 %1458  ;;  %v1445_v1 = vadd.f32 %v1437_v33, %v2352_v42 }
 0x127   :  { %v1140_v39 = vmax.f32 %v1132_v32, 0.0  ;;  %v1142_v45 = vmax.f32 %v1134_v23, 0.0  ;;  %878 = vmatprep.mubr.f32.mxu0 %v2047_v20  ;;  %955 = vmatprep.mubr.f32.mxu1 %v2047_v20  ;;  %v1447_v13 = vadd.f32 %v1439_v27, %v2352_v42  ;;  %v1470_v3 = vadd.f32 %v1464_v34, %v1449_v26 }
 0x128   :  { %v1479_v41 = vmax.f32 %v1471_v35, 0.0  ;;  %v1481_v31 = vmax.f32 %v1473_v48, 0.0  ;;  %v1472_v46 = vadd.f32 %v1464_v34, %v1451_v30  ;;  %v1446_v55 = vadd.f32 %v1438_v43, %v2368_v15 }
 0x129   :  { %1199 = vmatprep.subr.mxu0 %v1140_v39  ;;  %1276 = vmatprep.subr.mxu1 %v1142_v45  ;;  %v1448_v47 = vadd.f32 %v1440_v29, %v2368_v15  ;;  %v310_v63 = vmul.f32 %v2364_v61, %v2364_v61  ;;  %v311_v58 = vmul.f32 %v1780_v17, %v1780_v17  ;;  %v1478_v25 = vmax.f32 %v1470_v3, 0.0 }
 0x12a   :  { %1200 = vmatpush1.msra.mxu0 %v1139_v14  ;;  %1277 = vmatpush1.msra.mxu1 %v1141_v51  ;;  %v2436_v10 = vadd.f32 %v306_v19, %v305_v40  ;;  %v1467_v42 = vadd.f32 %v1459_v52, %v1446_v55  ;;  %v1466_v59 = vadd.f32 %v1459_v52, %v1445_v1  ;;  %v1480_v2 = vmax.f32 %v1472_v46, 0.0  ;;  %v2460_v21 = vpop.permute.xlu1 %794 }
 0x12b   :  { %1786 = vmatmul.mubr.msk.f32.gmra.mxu0 %vm434_vm3, %v788_v57  ;;  %1788 = vmatmul.mubr.msk.f32.gmra.mxu1 %vm434_vm3, %v788_v57  ;;  %v1469_v5 = vadd.f32 %v1459_v52, %v1448_v47  ;;  %v1468_v60 = vadd.f32 %v1459_v52, %v1447_v13  ;;  %v312_v15 = vsel %vm292_vm1, %v310_v63, 0.0  ;;  %v313_v24 = vsel %vm292_vm1, %v311_v58, 0.0 }
 0x12c   :  { %1532 = vmatprep.subr.mxu0 %v1479_v41  ;;  %1609 = vmatprep.subr.mxu1 %v1481_v31  ;;  %v2444_v61 = vadd.f32 %v313_v24, %v312_v15  ;;  %v1475_v4 = vmax.f32 %v1467_v42, 0.0  ;;  %v1474_v38 = vmax.f32 %v1466_v59, 0.0 }
 0x12d   :  { %1233 = vmatprep.mubr.f32.mxu0 %v2047_v20  ;;  %1310 = vmatprep.mubr.f32.mxu1 %v2047_v20  ;;  %v1477_v54 = vmax.f32 %v1469_v5, 0.0  ;;  %v1476_v49 = vmax.f32 %v1468_v60, 0.0 }
 0x12e   :  { %v2462_v12 = vpop.permute.xlu1 %799 }
 0x12f   :  { %1790 = vmatmul.mubr.msk.f32.vlgmr.msra.gmra.mxu0 %vm434_vm3, %v1148_v0  ;;  %1792 = vmatmul.mubr.msk.f32.vlgmr.msra.gmra.mxu1 %vm434_vm3, %v1148_v0 }
 0x130   :  { %1533 = vmatpush1.msra.mxu0 %v1478_v25  ;;  %1610 = vmatpush1.msra.mxu1 %v1480_v2 }
 0x131   :  { %1239 = vmatprep.mubr.f32.mxu0 %v2047_v20  ;;  %1316 = vmatprep.mubr.f32.mxu1 %v2047_v20 }
 0x132   :  { %1534 = vmatprep.subr.mxu0 %v1475_v4  ;;  %1611 = vmatprep.subr.mxu1 %v1477_v54  ;;  %v2464_v8 = vpop.permute.xlu1 %1155 }
 0x133   :  { %1791 = vmatmul.mubr.msk.f32.gmra.mxu0 %vm434_vm3, %v1149_v50  ;;  %1793 = vmatmul.mubr.msk.f32.gmra.mxu1 %vm434_vm3, %v1149_v50 }
 0x134   :  { %1535 = vmatpush1.msra.mxu0 %v1474_v38  ;;  %1612 = vmatpush1.msra.mxu1 %v1476_v49 }
 0x135   :  { %1568 = vmatprep.mubr.f32.mxu0 %v2047_v20  ;;  %1645 = vmatprep.mubr.f32.mxu1 %v2047_v20 }
 0x136   :  { %v2466_v9 = vpop.permute.xlu1 %1160 }
 0x137   :  { %1795 = vmatmul.mubr.msk.f32.vlgmr.msra.gmra.mxu0 %vm434_vm3, %v1483_v62  ;;  %1797 = vmatmul.mubr.msk.f32.vlgmr.msra.gmra.mxu1 %vm434_vm3, %v1483_v62 }
 0x138   :  { %1574 = vmatprep.mubr.f32.mxu0 %v2047_v20  ;;  %1651 = vmatprep.mubr.f32.mxu1 %v2047_v20 }
 0x13a   :  { %v427_v17 = vpop.permute.xlu1 %426 }
 0x13b   :  { %1796 = vmatmul.mubr.msk.f32.gmra.mxu0 %vm434_vm3, %v1484_v6  ;;  %1798 = vmatmul.mubr.msk.f32.gmra.mxu1 %vm434_vm3, %v1484_v6 }
 0x13e   :  { %v432_v18 = vpop.permute.xlu1 %431 }
 0x142   :  { %v2468_v26 = vpop.permute.xlu1 %1490 }
 0x145   :  { %v2478_v43 = vpop.xlane.xlu0 %296 }
 0x146   :  { %v2470_v30 = vpop.permute.xlu1 %1495 }
 0x14a   :  { %v2472_v20 = vpop.permute.xlu1 %980 }
 0x14d   :  { %v2480_v53 = vpop.permute.xlu0 %975 }
 0x14e   :  { %v2474_v56 = vpop.permute.xlu1 %1336 }
 0x151   :  { %v2484_v35 = vpop.permute.xlu0 %1676 }
 0x152   :  { %v2476_v33 = vpop.permute.xlu1 %1341 }
 0x155   :  { %v1385_v4 = vpop.permute.xlu0 %1384 }
 0x156   :  { %v608_v16 = vpop.permute.xlu1 %607 }
 0x15a   :  { %v613_v7 = vpop.permute.xlu1 %612 }
 0x15e   :  { %v2482_v29 = vpop.permute.xlu1 %1671 }
 0x162   :  { %v1024_v3 = vpop.permute.xlu1 %1023 }
 0x166   :  { %v655_v6 = vpop.permute.xlu1 %654 }
 0x1dc   :  { %v507_v11 = vpop.f32.mrf.mxu0  ;;  %v584_v27 = vpop.f32.mrf.mxu1 }
 0x1dd   :  { %v585_v28 = vadd.f32 %v584_v27, %v427_v17  ;;  %v508_v40 = vadd.f32 %v507_v11, %v427_v17  ;;  %v298_v27 = vmul.f32 %v2186_v36, %v2186_v36 }
 0x1de   :  { %v509_v34 = vpop.f32.mrf.mxu0  ;;  %v586_v32 = vpop.f32.mrf.mxu1 }
 0x1df   :  { %v510_v23 = vadd.f32 %v509_v34, %v427_v17  ;;  %v587_v44 = vadd.f32 %v586_v32, %v427_v17  ;;  %v597_v39 = vmax.f32 %v585_v28, 0.0  ;;  %v595_v42 = vmax.f32 %v508_v40, 0.0 }
 0x1e0   :  { %v513_v14 = vpop.f32.mrf.mxu0  ;;  %v590_v51 = vpop.f32.mrf.mxu1  ;;  %v2491_v28 = vrot.slane %v1385_v4, %v2162_v22  ;;  %v2494_v34 = vrot.slane %v1024_v3, %v2162_v22 }
 0x1e1   :  { %v514_v45 = vadd.f32 %v513_v14, %v432_v18  ;;  %v591_v48 = vadd.f32 %v590_v51, %v432_v18  ;;  %v596_v52 = vmax.f32 %v510_v23, 0.0  ;;  %v598_v1 = vmax.f32 %v587_v44, 0.0 }
 0x1e2   :  { %v515_v19 = vpop.f32.mrf.mxu0  ;;  %v592_v57 = vpop.f32.mrf.mxu1  ;;  %v617_v5 = vmul.f32 %v608_v16, %v597_v39  ;;  %v615_v17 = vmul.f32 %v608_v16, %v595_v42  ;;  %v2500_v39 = vrot.slane %v655_v6, %v2162_v22 }
 0x1e3   :  { %v516_v13 = vadd.f32 %v515_v19, %v432_v18  ;;  %v593_v41 = vadd.f32 %v592_v57, %v432_v18  ;;  %v599_v31 = vmax.f32 %v514_v45, 0.0  ;;  %v601_v46 = vmax.f32 %v591_v48, 0.0 }
 0x1e4   :  { %v616_v60 = vmul.f32 %v608_v16, %v596_v52  ;;  %v618_v0 = vmul.f32 %v608_v16, %v598_v1  ;;  %v299_v57 = vmul.f32 %v2188_v37, %v2188_v37 }
 0x1e5   :  { %v600_v55 = vmax.f32 %v516_v13, 0.0  ;;  %v602_v47 = vmax.f32 %v593_v41, 0.0  ;;  %v874_v63 = vpop.f32.mrf.mxu0  ;;  %v951_v58 = vpop.f32.mrf.mxu1  ;;  %v621_v59 = vmul.f32 %v613_v7, %v601_v46  ;;  %v619_v54 = vmul.f32 %v613_v7, %v599_v31 }
 0x1e6   :  { %v952_v49 = vadd.f32 %v951_v58, %v2460_v21  ;;  %v875_v32 = vadd.f32 %v874_v63, %v2460_v21  ;;  %v2506_v41 = vsel %vm292_vm1, %v298_v27, 0.0  ;;  %v2517_v4 = vsel %vm292_vm1, %v299_v57, 0.0 }
 0x1e7   :  { %v620_v15 = vmul.f32 %v613_v7, %v600_v55  ;;  %v622_v24 = vmul.f32 %v613_v7, %v602_v47  ;;  %v876_v25 = vpop.f32.mrf.mxu0  ;;  %v953_v2 = vpop.f32.mrf.mxu1  ;;  %v637_v38 = vadd.f32 %v621_v59, %v617_v5  ;;  %v623_v14 = vadd.f32 %v619_v54, %v615_v17 }
 0x1e8   :  { %v954_v11 = vadd.f32 %v953_v2, %v2460_v21  ;;  %v964_v51 = vmax.f32 %v952_v49, 0.0  ;;  %v877_v16 = vadd.f32 %v876_v25, %v2460_v21  ;;  %v962_v3 = vmax.f32 %v875_v32, 0.0 }
 0x1e9   :  { %v630_v50 = vadd.f32 %v620_v15, %v616_v60  ;;  %v644_v62 = vadd.f32 %v622_v24, %v618_v0  ;;  %v638_v18 = vrot.slane %v637_v38, 4  ;;  %v624_v63 = vrot.slane %v623_v14, 4 }
 0x1ea   :  { %v965_v1 = vmax.f32 %v954_v11, 0.0  ;;  %v985_v58 = vmul.f32 %v2480_v53, %v964_v51  ;;  %v963_v42 = vmax.f32 %v877_v16, 0.0 }
 0x1eb   :  { %v645_v7 = vrot.slane %v644_v62, 4  ;;  %v880_v23 = vpop.f32.mrf.mxu0  ;;  %v957_v44 = vpop.f32.mrf.mxu1  ;;  %v631_v36 = vrot.slane %v630_v50, 4  ;;  %v639_v52 = vadd.f32 %v638_v18, %v637_v38  ;;  %v2521_v17 = vadd.f32 %v624_v63, %v623_v14 }
 0x1ec   :  { %v958_v40 = vadd.f32 %v957_v44, %v2462_v12  ;;  %v881_v45 = vadd.f32 %v880_v23, %v2462_v12  ;;  %v986_v2 = vmul.f32 %v2480_v53, %v965_v1  ;;  %v983_v18 = vmul.f32 %v2480_v53, %v962_v3 }
 0x1ed   :  { %v882_v48 = vpop.f32.mrf.mxu0  ;;  %v959_v19 = vpop.f32.mrf.mxu1  ;;  %v646_v21 = vadd.f32 %v645_v7, %v644_v62  ;;  %v2512_v5 = vadd.f32 %v631_v36, %v630_v50  ;;  %v640_v25 = vrot.slane %v639_v52, 2  ;;  %v984_v11 = vmul.f32 %v2480_v53, %v963_v42 }
 0x1ee   :  { %v968_v13 = vmax.f32 %v958_v40, 0.0  ;;  %v883_v31 = vadd.f32 %v882_v48, %v2462_v12  ;;  %v960_v46 = vadd.f32 %v959_v19, %v2462_v12  ;;  %v966_v59 = vmax.f32 %v881_v45, 0.0 }
 0x1ef   :  { %v1235_v55 = vpop.f32.mrf.mxu0  ;;  %v1312_v47 = vpop.f32.mrf.mxu1  ;;  %v647_v54 = vrot.slane %v646_v21, 2  ;;  %v633_v7 = vrot.slane %v2512_v5, 2  ;;  %v2531_v45 = vadd.f32 %v640_v25, %v639_v52 }
 0x1f0   :  { %v989_v37 = vmul.f32 %v2472_v20, %v968_v13  ;;  %v967_v60 = vmax.f32 %v883_v31, 0.0  ;;  %v969_v0 = vmax.f32 %v960_v46, 0.0  ;;  %v1313_v12 = vadd.f32 %v1312_v47, %v2464_v8 }
 0x1f1   :  { %v1237_v15 = vpop.f32.mrf.mxu0  ;;  %v1314_v24 = vpop.f32.mrf.mxu1  ;;  %v1236_v50 = vadd.f32 %v1235_v55, %v2464_v8  ;;  %v987_v32 = vmul.f32 %v2472_v20, %v966_v59  ;;  %v2534_v13 = vadd.f32 %v647_v54, %v646_v21 }
 0x1f2   :  { %v1005_v38 = vadd.f32 %v989_v37, %v985_v58  ;;  %v990_v49 = vmul.f32 %v2472_v20, %v969_v0  ;;  %v988_v27 = vmul.f32 %v2472_v20, %v967_v60  ;;  %v1315_v44 = vadd.f32 %v1314_v24, %v2464_v8 }
 0x1f3   :  { %v1241_v62 = vpop.f32.mrf.mxu0  ;;  %v1318_v6 = vpop.f32.mrf.mxu1  ;;  %v1325_v40 = vmax.f32 %v1313_v12, 0.0  ;;  %v1323_v53 = vmax.f32 %v1236_v50, 0.0  ;;  %v1238_v19 = vadd.f32 %v1237_v15, %v2464_v8  ;;  %v2536_v55 = vadd.f32 %v987_v32, %v983_v18 }
 0x1f4   :  { %v1012_v23 = vadd.f32 %v990_v49, %v986_v2  ;;  %v1242_v36 = vadd.f32 %v1241_v62, %v2466_v9  ;;  %v1319_v14 = vadd.f32 %v1318_v6, %v2466_v9  ;;  %v1006_v48 = vrot.slane %v1005_v38, 4 }
 0x1f5   :  { %v1243_v51 = vpop.f32.mrf.mxu0  ;;  %v1320_v16 = vpop.f32.mrf.mxu1  ;;  %v998_v20 = vadd.f32 %v988_v27, %v984_v11  ;;  %v1326_v47 = vmax.f32 %v1315_v44, 0.0  ;;  %v1346_v37 = vmul.f32 %v2474_v56, %v1325_v40  ;;  %v1324_v0 = vmax.f32 %v1238_v19, 0.0 }
 0x1f6   :  { %v1013_v3 = vrot.slane %v1012_v23, 4  ;;  %v1327_v31 = vmax.f32 %v1242_v36, 0.0  ;;  %v1329_v46 = vmax.f32 %v1319_v14, 0.0  ;;  %v1244_v63 = vadd.f32 %v1243_v51, %v2466_v9 }
 0x1f7   :  { %v1570_v57 = vpop.f32.mrf.mxu0  ;;  %v1647_v1 = vpop.f32.mrf.mxu1  ;;  %v1321_v52 = vadd.f32 %v1320_v16, %v2466_v9  ;;  %v1007_v60 = vadd.f32 %v1006_v48, %v1005_v38  ;;  %v999_v25 = vrot.slane %v998_v20, 4  ;;  %v1344_v12 = vmul.f32 %v2474_v56, %v1323_v53 }
 0x1f8   :  { %v1348_v8 = vmul.f32 %v2476_v33, %v1327_v31  ;;  %v1350_v21 = vmul.f32 %v2476_v33, %v1329_v46  ;;  %v1648_v59 = vadd.f32 %v1647_v1, %v2468_v26  ;;  %v1328_v15 = vmax.f32 %v1244_v63, 0.0 }
 0x1f9   :  { %v1572_v58 = vpop.f32.mrf.mxu0  ;;  %v1649_v42 = vpop.f32.mrf.mxu1  ;;  %v1330_v24 = vmax.f32 %v1321_v52, 0.0  ;;  %v1014_v2 = vadd.f32 %v1013_v3, %v1012_v23  ;;  %v1347_v50 = vmul.f32 %v2474_v56, %v1326_v47  ;;  %v1571_v6 = vadd.f32 %v1570_v57, %v2468_v26 }
 0x1fa   :  { %v1366_v54 = vadd.f32 %v1350_v21, %v1346_v37  ;;  %v1650_v18 = vadd.f32 %v1649_v42, %v2468_v26  ;;  %v992_v38 = vrot.slane %v2536_v55, 4  ;;  %v2550_v11 = vadd.f32 %v1348_v8, %v1344_v12 }
 0x1fb   :  { %v1576_v9 = vpop.f32.mrf.mxu0  ;;  %v1653_v49 = vpop.f32.mrf.mxu1  ;;  %v1351_v62 = vmul.f32 %v2476_v33, %v1330_v24  ;;  %v1660_v32 = vmax.f32 %v1648_v59, 0.0  ;;  %v1008_v23 = vrot.slane %v1007_v60, 2  ;;  %v1345_v44 = vmul.f32 %v2474_v56, %v1324_v0 }
 0x1fc   :  { %v1367_v27 = vrot.slane %v1366_v54, 4  ;;  %v1349_v51 = vmul.f32 %v2476_v33, %v1328_v15  ;;  %v2554_v40 = vadd.f32 %v999_v25, %v998_v20  ;;  %v1015_v36 = vrot.slane %v1014_v2, 2 }
 0x1fd   :  { %v1373_v16 = vadd.f32 %v1351_v62, %v1347_v50  ;;  %v1573_v14 = vadd.f32 %v1572_v58, %v2468_v26  ;;  %v1654_v48 = vadd.f32 %v1653_v49, %v2470_v30  ;;  %v1578_v53 = vpop.f32.mrf.mxu0  ;;  %v1655_v19 = vpop.f32.mrf.mxu1  ;;  %v1658_v3 = vmax.f32 %v1571_v6, 0.0 }
 0x1fe   :  { %v1368_v57 = vadd.f32 %v1367_v27, %v1366_v54  ;;  %v1661_v31 = vmax.f32 %v1650_v18, 0.0  ;;  %v1353_v46 = vrot.slane %v2550_v11, 4  ;;  %v1681_v56 = vmul.f32 %v2482_v29, %v1660_v32 }
 0x1ff   :  { %v1374_v1 = vrot.slane %v1373_v16, 4  ;;  %v1577_v33 = vadd.f32 %v1576_v9, %v2470_v30  ;;  %v1664_v47 = vmax.f32 %v1654_v48, 0.0  ;;  %v1359_v20 = vadd.f32 %v1349_v51, %v1345_v44 }
 0x200   :  { %v1579_v52 = vadd.f32 %v1578_v53, %v2470_v30  ;;  %v1656_v26 = vadd.f32 %v1655_v19, %v2470_v30  ;;  %v1659_v58 = vmax.f32 %v1573_v14, 0.0  ;;  %v642_v37 = vrot.slane %v2531_v45, 1 }
 0x201   :  { %v1375_v63 = vadd.f32 %v1374_v1, %v1373_v16  ;;  %v1685_v42 = vmul.f32 %v2484_v35, %v1664_v47  ;;  %v649_v8 = vrot.slane %v2534_v13, 1  ;;  %v1369_v21 = vrot.slane %v1368_v57, 2 }
 0x202   :  { %v1682_v59 = vmul.f32 %v2482_v29, %v1661_v31  ;;  %v1663_v0 = vmax.f32 %v1579_v52, 0.0  ;;  %v1665_v15 = vmax.f32 %v1656_v26, 0.0  ;;  %v1662_v24 = vmax.f32 %v1577_v33, 0.0 }
 0x203   :  { %v1701_v25 = vadd.f32 %v1685_v42, %v1681_v56  ;;  %v643_v12 = vadd.f32 %v642_v37, %v2531_v45  ;;  %v650_v54 = vadd.f32 %v649_v8, %v2534_v13  ;;  %v1376_v9 = vrot.slane %v1375_v63, 2 }
 0x204   :  { %v1686_v30 = vmul.f32 %v2484_v35, %v1665_v15  ;;  %v1009_v49 = vadd.f32 %v1008_v23, %v1007_v60  ;;  %v1016_v50 = vadd.f32 %v1015_v36, %v1014_v2  ;;  %v1684_v6 = vmul.f32 %v2484_v35, %v1663_v0  ;;  %v1720_v0 = vpop.permute.xlu0 %1719 }
 0x205   :  { %v1702_v62 = vrot.slane %v1701_v25, 4  ;;  %v2572_v18 = vadd.f32 %v2500_v39, %v643_v12  ;;  %v2575_v27 = vadd.f32 %v2500_v39, %v650_v54  ;;  %v1680_v32 = vmul.f32 %v2482_v29, %v1659_v58 }
 0x206   :  { %v1708_v44 = vadd.f32 %v1686_v30, %v1682_v59  ;;  %v1010_v45 = vrot.slane %v1009_v49, 1  ;;  %v1017_v51 = vrot.slane %v1016_v50, 1  ;;  %v1683_v13 = vmul.f32 %v2484_v35, %v1662_v24 }
 0x207   :  { %v1703_v16 = vadd.f32 %v1702_v62, %v1701_v25  ;;  %v668_v60 = vmax.f32 %v2572_v18, %v2575_v27  ;;  %v1370_v2 = vadd.f32 %v1369_v21, %v1368_v57  ;;  %v1679_v23 = vmul.f32 %v2482_v29, %v1658_v3 }
 0x208   :  { %v1709_v36 = vrot.slane %v1708_v44, 4  ;;  %v1011_v14 = vadd.f32 %v1010_v45, %v1009_v49  ;;  %v1018_v48 = vadd.f32 %v1017_v51, %v1016_v50  ;;  %v1694_v19 = vadd.f32 %v1684_v6, %v1680_v32 }
 0x209   :  { %v1704_v53 = vrot.slane %v1703_v16, 2  ;;  %669 = vmax.xlane.f32.xlu0 %v668_v60  ;;  %v1371_v1 = vrot.slane %v1370_v2, 1  ;;  %v1377_v31 = vadd.f32 %v1376_v9, %v1375_v63  ;;  %v1360_v56 = vrot.slane %v1359_v20, 4 }
 0x20a   :  { %v1710_v33 = vadd.f32 %v1709_v36, %v1708_v44  ;;  %v2583_v47 = vadd.f32 %v2494_v34, %v1011_v14  ;;  %v2586_v35 = vadd.f32 %v2494_v34, %v1018_v48  ;;  %v1687_v52 = vadd.f32 %v1683_v13, %v1679_v23 }
 0x20b   :  { %v1372_v57 = vadd.f32 %v1371_v1, %v1370_v2  ;;  %v1378_v26 = vrot.slane %v1377_v31, 1  ;;  %v1705_v29 = vadd.f32 %v1704_v53, %v1703_v16  ;;  %v626_v3 = vrot.slane %v2521_v17, 2 }
 0x20c   :  { %v993_v58 = vadd.f32 %v992_v38, %v2536_v55  ;;  %v1711_v42 = vrot.slane %v1710_v33, 2  ;;  %v1037_v63 = vmax.f32 %v2583_v47, %v2586_v35  ;;  %v1695_v37 = vrot.slane %v1694_v19, 4 }
 0x20d   :  { %v302_v8 = vadd.f32 %v2517_v4, %v2506_v41  ;;  %v1379_v21 = vadd.f32 %v1378_v26, %v1377_v31  ;;  %v1706_v59 = vrot.slane %v1705_v29, 1  ;;  %v1001_v15 = vrot.slane %v2554_v40, 2 }
 0x20e   :  { %v1361_v24 = vadd.f32 %v1360_v56, %v1359_v20  ;;  %1038 = vmax.xlane.f32.xlu1 %v1037_v63  ;;  %v1712_v25 = vadd.f32 %v1711_v42, %v1710_v33  ;;  %v634_v55 = vadd.f32 %v633_v7, %v2512_v5  ;;  %v1354_v38 = vadd.f32 %v1353_v46, %v2550_v11 }
 0x20f   :  { %v1688_v12 = vrot.slane %v1687_v52, 4  ;;  %v2604_v54 = vadd.f32 %v2491_v28, %v1372_v57  ;;  %v2607_v41 = vadd.f32 %v2491_v28, %v1379_v21  ;;  %v994_v4 = vrot.slane %v993_v58, 2 }
 0x210   :  { %v1707_v9 = vadd.f32 %v1706_v59, %v1705_v29  ;;  %v1713_v20 = vrot.slane %v1712_v25, 1  ;;  %v627_v30 = vadd.f32 %v626_v3, %v2521_v17  ;;  %v1725_v49 = vrot.slane %v1720_v0, %v2162_v22 }
 0x211   :  { %v1696_v50 = vadd.f32 %v1695_v37, %v1694_v19  ;;  %v1398_v5 = vmax.f32 %v2604_v54, %v2607_v41  ;;  %v1362_v7 = vrot.slane %v1361_v24, 2  ;;  %v635_v46 = vrot.slane %v634_v55, 1 }
 0x212   :  { %303 = vadd.xlane.f32.xlu1 %v302_v8  ;;  %v1714_v11 = vadd.f32 %v1713_v20, %v1712_v25  ;;  %v1002_v62 = vadd.f32 %v1001_v15, %v2554_v40  ;;  %v1355_v6 = vrot.slane %v1354_v38, 2  ;;  %v1689_v32 = vadd.f32 %v1688_v12, %v1687_v52 }
 0x213   :  { %1399 = vmax.xlane.f32.xlu0 %v1398_v5  ;;  %v2614_v44 = vadd.f32 %v1725_v49, %v1707_v9  ;;  %v628_v17 = vrot.slane %v627_v30, 1  ;;  %v995_v51 = vadd.f32 %v994_v4, %v993_v58  ;;  %v1697_v22 = vrot.slane %v1696_v50, 2 }
 0x214   :  { %v2616_v45 = vadd.f32 %v1725_v49, %v1714_v11  ;;  %v636_v16 = vadd.f32 %v635_v46, %v634_v55  ;;  %v1003_v60 = vrot.slane %v1002_v62, 1  ;;  %v1363_v2 = vadd.f32 %v1362_v7, %v1361_v24 }
 0x215   :  { %v1690_v23 = vrot.slane %v1689_v32, 2  ;;  %v629_v40 = vadd.f32 %v628_v17, %v627_v30  ;;  %v996_v36 = vrot.slane %v995_v51, 1  ;;  %v1356_v14 = vadd.f32 %v1355_v6, %v1354_v38 }
 0x216   :  { %315 = vadd.xlane.f32.xlu1 %v2444_v61  ;;  %v1733_v13 = vmax.f32 %v2614_v44, %v2616_v45  ;;  %v662_v48 = vadd.f32 %v2500_v39, %v636_v16  ;;  %v1004_v53 = vadd.f32 %v1003_v60, %v1002_v62  ;;  %v1364_v19 = vrot.slane %v1363_v2, 1 }
 0x217   :  { %v1698_v1 = vadd.f32 %v1697_v22, %v1696_v50  ;;  %v661_v61 = vadd.f32 %v2500_v39, %v629_v40  ;;  %v997_v31 = vadd.f32 %v996_v36, %v995_v51  ;;  %v1357_v56 = vrot.slane %v1356_v14, 1 }
 0x218   :  { %1734 = vmax.xlane.f32.xlu0 %v1733_v13  ;;  %v1691_v33 = vadd.f32 %v1690_v23, %v1689_v32  ;;  %v1031_v57 = vadd.f32 %v2494_v34, %v1004_v53  ;;  %v1365_v26 = vadd.f32 %v1364_v19, %v1363_v2 }
 0x219   :  { %v665_v52 = vadd.f32 %v662_v48, %v661_v61  ;;  %v1699_v29 = vrot.slane %v1698_v1, 1  ;;  %v1030_v3 = vadd.f32 %v2494_v34, %v997_v31  ;;  %v1358_v58 = vadd.f32 %v1357_v56, %v1356_v14 }
 0x21a   :  { %v1692_v42 = vrot.slane %v1691_v33, 1  ;;  %v1392_v37 = vadd.f32 %v2491_v28, %v1365_v26 }
 0x21b   :  { %v1034_v63 = vadd.f32 %v1031_v57, %v1030_v3  ;;  %v1700_v8 = vadd.f32 %v1699_v29, %v1698_v1 }
 0x21c   :  { %308 = vadd.xlane.f32.xlu0 %v2436_v10  ;;  %v1391_v10 = vadd.f32 %v2491_v28, %v1358_v58  ;;  %v1693_v39 = vadd.f32 %v1692_v42, %v1691_v33 }
 0x21d   :  { %v1727_v59 = vadd.f32 %v1725_v49, %v1700_v8 }
 0x21e   :  { %v1395_v21 = vadd.f32 %v1392_v37, %v1391_v10  ;;  %v1726_v0 = vadd.f32 %v1725_v49, %v1693_v39 }
 0x220   :  { %666 = vadd.xlane.f32.xlu0 %v665_v52  ;;  %v1730_v15 = vadd.f32 %v1727_v59, %v1726_v0 }
 0x224   :  { %1035 = vadd.xlane.f32.xlu0 %v1034_v63 }
 0x228   :  { %1396 = vadd.xlane.f32.xlu0 %v1395_v21 }
 0x22c   :  { %1731 = vadd.xlane.f32.xlu0 %v1730_v15 }
 0x292   :  { %v670_v24 = vpop.xlane.xlu0 %669 }
 0x293   :  { %v671_v25 = vsub.f32 %v2572_v18, %v670_v24  ;;  %v672_v34 = vsub.f32 %v2575_v27, %v670_v24 }
 0x295   :  { %v673_v55 = vmul.f32 1.442695, %v671_v25  ;;  %v675_v38 = vmul.f32 1.442695, %v672_v34 }
 0x297   :  { %1828 = vpow2.f32 %v673_v55  ;;  %v1039_v12 = vpop.xlane.xlu1 %1038 }
 0x298   :  { %1830 = vpow2.f32 %v675_v38  ;;  %v1040_v4 = vsub.f32 %v2583_v47, %v1039_v12  ;;  %v1041_v28 = vsub.f32 %v2586_v35, %v1039_v12 }
 0x29a   :  { %v1042_v9 = vmul.f32 1.442695, %v1040_v4  ;;  %v1044_v20 = vmul.f32 1.442695, %v1041_v28 }
 0x29b   :  { %v304_v5 = vpop.xlane.xlu1 %303 }
 0x29c   :  { %1832 = vpow2.f32 %v1042_v9  ;;  %v1400_v30 = vpop.xlane.xlu0 %1399 }
 0x29d   :  { %1834 = vpow2.f32 %v1044_v20  ;;  %v1401_v49 = vsub.f32 %v2604_v54, %v1400_v30  ;;  %v1402_v18 = vsub.f32 %v2607_v41, %v1400_v30  ;;  %v318_v54 = vsel %vm317_vm4, %v2478_v43, %v304_v5 }
 0x29f   :  { %v1403_v50 = vmul.f32 1.442695, %v1401_v49  ;;  %v1405_v27 = vmul.f32 1.442695, %v1402_v18  ;;  %v316_v32 = vpop.xlane.xlu1 %315 }
 0x2a1   :  { %1836 = vpow2.f32 %v1403_v50  ;;  %v1735_v7 = vpop.xlane.xlu0 %1734 }
 0x2a2   :  { %1838 = vpow2.f32 %v1405_v27  ;;  %v1736_v47 = vsub.f32 %v2614_v44, %v1735_v7  ;;  %v1737_v35 = vsub.f32 %v2616_v45, %v1735_v7 }
 0x2a4   :  { %v1829_v11 = vpop.eup %1828  ;;  %v1738_v46 = vmul.f32 1.442695, %v1736_v47  ;;  %v1740_v62 = vmul.f32 1.442695, %v1737_v35 }
 0x2a5   :  { %v1831_v6 = vpop.eup %1830  ;;  %v309_v41 = vpop.xlane.xlu0 %308 }
 0x2a6   :  { %v677_v17 = vadd.f32 %v1831_v6, %v1829_v11  ;;  %1840 = vpow2.f32 %v1738_v46  ;;  %v320_v51 = vsel %vm319_vm5, %v318_v54, %v309_v41 }
 0x2a7   :  { %1842 = vpow2.f32 %v1740_v62  ;;  %v322_v44 = vsel %vm321_vm6, %v320_v51, %v316_v32 }
 0x2a8   :  { %678 = vadd.xlane.f32.xlu1 %v677_v17  ;;  %324 = vst.msk [vmem:[%s2665_s10] sm:$0x3] %vm323_vm7, %v322_v44 }
 0x2a9   :  { %v1833_v45 = vpop.eup %1832  ;;  %v667_v22 = vpop.xlane.xlu0 %666 }
 0x2aa   :  { %v1835_v13 = vpop.eup %1834  ;;  %v680_v16 = vsel %vm317_vm4, %v667_v22, %v670_v24 }
 0x2ab   :  { %v1046_v43 = vadd.f32 %v1835_v13, %v1833_v45 }
 0x2ad   :  { %1047 = vadd.xlane.f32.xlu1 %v1046_v43  ;;  %v1036_v60 = vpop.xlane.xlu0 %1035 }
 0x2ae   :  { %v1837_v2 = vpop.eup %1836  ;;  %v1049_v23 = vsel %vm317_vm4, %v1036_v60, %v1039_v12 }
 0x2af   :  { %v1839_v40 = vpop.eup %1838 }
 0x2b0   :  { %v1407_v36 = vadd.f32 %v1839_v40, %v1837_v2 }
 0x2b1   :  { %v1397_v14 = vpop.xlane.xlu0 %1396 }
 0x2b2   :  { %1408 = vadd.xlane.f32.xlu1 %v1407_v36  ;;  %v1410_v48 = vsel %vm317_vm4, %v1397_v14, %v1400_v30 }
 0x2b3   :  { %v1841_v53 = vpop.eup %1840 }
 0x2b4   :  { %v1843_v19 = vpop.eup %1842 }
 0x2b5   :  { %v1732_v1 = vpop.xlane.xlu0 %1731  ;;  %v1742_v61 = vadd.f32 %v1843_v19, %v1841_v53 }
 0x2b6   :  { %v1745_v31 = vsel %vm317_vm4, %v1732_v1, %v1735_v7 }
 0x2b7   :  { %1743 = vadd.xlane.f32.xlu1 %v1742_v61 }
 0x331   :  { %v679_v56 = vpop.xlane.xlu1 %678 }
 0x332   :  { %v681_v26 = vsel %vm319_vm5, %v680_v16, %v679_v56 }
 0x336   :  { %v1048_v33 = vpop.xlane.xlu1 %1047 }
 0x337   :  { %v1050_v52 = vsel %vm319_vm5, %v1049_v23, %v1048_v33 }
 0x338   :  { %v1748_v57 = vrot.slane %v1050_v52, 7 }
 0x33a   :  { %v1756_v29 = vsel %vm262_vm0, %v681_v26, %v1748_v57 }
 0x33b   :  { %v1409_v3 = vpop.xlane.xlu1 %1408 }
 0x33c   :  { %v1411_v58 = vsel %vm319_vm5, %v1410_v48, %v1409_v3 }
 0x33d   :  { %v1751_v42 = vrot.slane %v1411_v58, 6 }
 0x33f   :  { %v1757_v63 = vsel %vm292_vm1, %v1756_v29, %v1751_v42 }
 0x340   :  { %v1744_v37 = vpop.xlane.xlu1 %1743 }
 0x341   :  { %v1746_v8 = vsel %vm319_vm5, %v1745_v31, %v1744_v37 }
 0x342   :  { %v1754_v10 = vrot.slane %v1746_v8, 5 }
 0x344   :  { %v1759_v39 = vsel %vm1758_vm8, %v1757_v63, %v1754_v10 }
 0x345   :  { %1761 = vst.msk [vmem:[%s2666_s11] sm:$0xf] %vm1760_vm9, %v1759_v39 }
 0x346   :  { %1770 = vsyncpa [#allocation3], 1 }
 0x347   :  { %1771 = vsyncpa [#allocation5], 1 }
 0x348   :  { %1772 = vsyncpa [#allocation8], 1 }
 0x349   :  { %1773 = vsyncpa [#allocation11], 1 }
 0x34a   :  { %1774 = vsyncpa [#allocation14], 1 }

</bundles_post_ra>
